<compile_context>
chip_gen: v7x
topology: tpu7x:2x2x1
jax: 0.10.0
libtpu: 0.0.40
codegen_flags: <defaults>
</compile_context>

<pallas_src>
import jax
import jax.numpy as jnp
from jax import lax
from jax.experimental import pallas as pl
from jax.experimental.pallas import tpu as pltpu

LN_EPS = 1e-5  # PyTorch nn.LayerNorm default


def _layernorm(x, gamma, beta):
    # x: (B, H), gamma/beta: (1, H); biased variance, like torch LayerNorm.
    mean = jnp.mean(x, axis=-1, keepdims=True)
    var = jnp.mean((x - mean) ** 2, axis=-1, keepdims=True)
    inv = lax.rsqrt(var + LN_EPS)
    return (x - mean) * inv * gamma + beta


def hybrid_rnn_kernel(x_ref, h0_ref, h20_ref,
                      w1_ref, b1_ref, w2_ref, b2_ref,
                      gamma_ref, beta_ref,
                      out_ref):
    T = x_ref.shape[0]

    # Hoist all loop-invariant loads out of the recurrence.
    w1 = w1_ref[...]        # (I+H, H)
    w2 = w2_ref[...]        # (2H,  H)
    b1 = b1_ref[...]        # (1, H)
    b2 = b2_ref[...]        # (1, H)
    gamma = gamma_ref[...]  # (1, H)
    beta = beta_ref[...]    # (1, H)

    def step(t, carry):
        h, h2 = carry
        x_t = x_ref[t]  # (B, I) slab from resident VMEM x

        # Cell 1: Linear(cat([x_t, h])) -> shared LayerNorm -> tanh
        pre = jnp.dot(jnp.concatenate([x_t, h], axis=-1), w1,
                      preferred_element_type=jnp.float32) + b1
        h = jnp.tanh(_layernorm(pre, gamma, beta))

        # Cell 2: Linear_2(cat([h, h2])) -> shared LayerNorm -> tanh
        pre2 = jnp.dot(jnp.concatenate([h, h2], axis=-1), w2,
                       preferred_element_type=jnp.float32) + b2
        h2 = jnp.tanh(_layernorm(pre2, gamma, beta))
        return (h, h2)

    h, h2 = lax.fori_loop(0, T, step, (h0_ref[...], h20_ref[...]), unroll=True)
    out_ref[...] = h2


def hybrid_rnn_forward(x_tbi, hidden, hidden_2, params):
    """x_tbi: (T, B, I) time-major; hidden/hidden_2: (B, H). Returns (B, H)."""
    T, B, I = x_tbi.shape
    H = hidden.shape[-1]
    w1, b1, w2, b2, gamma, beta = params

    vmem_full = pl.BlockSpec(memory_space=pltpu.MemorySpace.VMEM)

    return pl.pallas_call(
        hybrid_rnn_kernel,
        out_shape=jax.ShapeDtypeStruct((B, H), jnp.float32),
        in_specs=[vmem_full] * 9,     # x, h0, h20, W1, b1, W2, b2, gamma, beta
        out_specs=vmem_full,
    )(x_tbi, hidden, hidden_2, w1, b1, w2, b2, gamma, beta)


def reference_forward(x_bti, hidden, hidden_2, params):
    """Pure-JAX reference mirroring the PyTorch forward (batch-major x)."""
    w1, b1, w2, b2, gamma, beta = params
    T = x_bti.shape[1]
    for i in range(T):
        pre = jnp.concatenate([x_bti[:, i, :], hidden], axis=-1) @ w1 + b1
        hidden = jnp.tanh(_layernorm(pre, gamma, beta))
        pre2 = jnp.concatenate([hidden, hidden_2], axis=-1) @ w2 + b2
        hidden_2 = jnp.tanh(_layernorm(pre2, gamma, beta))
    return hidden_2


def init_params(key, input_size, hidden_size):
    """Fused-Linear layout: W1 (I+H, H), W2 (2H, H) = PyTorch weight.T."""
    ks = jax.random.split(key, 4)
    scale1 = 1.0 / jnp.sqrt(input_size + hidden_size)
    scale2 = 1.0 / jnp.sqrt(2 * hidden_size)
    w1 = jax.random.uniform(ks[0], (input_size + hidden_size, hidden_size),
                            jnp.float32, -scale1, scale1)
    b1 = jax.random.uniform(ks[1], (1, hidden_size), jnp.float32, -scale1, scale1)
    w2 = jax.random.uniform(ks[2], (2 * hidden_size, hidden_size),
                            jnp.float32, -scale2, scale2)
    b2 = jax.random.uniform(ks[3], (1, hidden_size), jnp.float32, -scale2, scale2)
    gamma = jnp.ones((1, hidden_size), jnp.float32)   # shared nn.LayerNorm init
    beta = jnp.zeros((1, hidden_size), jnp.float32)
    return (w1, b1, w2, b2, gamma, beta)


if __name__ == "__main__":
    B, T, I, H = 8, 8, 16, 32
    key = jax.random.PRNGKey(0)
    kx, kp = jax.random.split(key)

    x_bti = jax.random.normal(kx, (B, T, I), jnp.float32)   # PyTorch x: (batch, seq, input)
    hidden = jnp.zeros((B, H), jnp.float32)                  # init_hidden
    hidden_2 = jnp.zeros((B, H), jnp.float32)
    params = init_params(kp, I, H)

    x_tbi = jnp.transpose(x_bti, (1, 0, 2))                  # -> (T, B, I) time-major

    out = hybrid_rnn_forward(x_tbi, hidden, hidden_2, params)
    out = jax.block_until_ready(out)

    ref = reference_forward(x_bti, hidden, hidden_2, params)
    assert out.shape == (B, H)
    assert jnp.allclose(out, ref, atol=1e-5, rtol=1e-5), "mismatch vs reference"

    print("KERNEL_OK")
</pallas_src>

<mosaic_0001>
module attributes {stable_mosaic.version = 11 : i64} {
  func.func @hybrid_rnn_kernel(%arg0: memref<8x8x16xf32, #tpu.memory_space<vmem>>, %arg1: memref<8x32xf32, #tpu.memory_space<vmem>>, %arg2: memref<8x32xf32, #tpu.memory_space<vmem>>, %arg3: memref<48x32xf32, #tpu.memory_space<vmem>>, %arg4: memref<1x32xf32, #tpu.memory_space<vmem>>, %arg5: memref<64x32xf32, #tpu.memory_space<vmem>>, %arg6: memref<1x32xf32, #tpu.memory_space<vmem>>, %arg7: memref<1x32xf32, #tpu.memory_space<vmem>>, %arg8: memref<1x32xf32, #tpu.memory_space<vmem>>, %arg9: memref<8x32xf32, #tpu.memory_space<vmem>>) attributes {dimension_semantics = [], scalar_prefetch = 0 : i64, scratch_operands = 0 : i64, tpu.core_type = #tpu.core_type<tc>} {
    %c0 = arith.constant 0 : index
    %c0_0 = arith.constant 0 : index
    %0 = vector.load %arg3[%c0, %c0_0] : memref<48x32xf32, #tpu.memory_space<vmem>>, vector<48x32xf32>
    %c0_1 = arith.constant 0 : index
    %c0_2 = arith.constant 0 : index
    %1 = vector.load %arg5[%c0_1, %c0_2] : memref<64x32xf32, #tpu.memory_space<vmem>>, vector<64x32xf32>
    %c0_3 = arith.constant 0 : index
    %c0_4 = arith.constant 0 : index
    %2 = vector.load %arg4[%c0_3, %c0_4] : memref<1x32xf32, #tpu.memory_space<vmem>>, vector<1x32xf32>
    %c0_5 = arith.constant 0 : index
    %c0_6 = arith.constant 0 : index
    %3 = vector.load %arg6[%c0_5, %c0_6] : memref<1x32xf32, #tpu.memory_space<vmem>>, vector<1x32xf32>
    %c0_7 = arith.constant 0 : index
    %c0_8 = arith.constant 0 : index
    %4 = vector.load %arg7[%c0_7, %c0_8] : memref<1x32xf32, #tpu.memory_space<vmem>>, vector<1x32xf32>
    %c0_9 = arith.constant 0 : index
    %c0_10 = arith.constant 0 : index
    %5 = vector.load %arg8[%c0_9, %c0_10] : memref<1x32xf32, #tpu.memory_space<vmem>>, vector<1x32xf32>
    %c0_11 = arith.constant 0 : index
    %c0_12 = arith.constant 0 : index
    %6 = vector.load %arg1[%c0_11, %c0_12] : memref<8x32xf32, #tpu.memory_space<vmem>>, vector<8x32xf32>
    %c0_13 = arith.constant 0 : index
    %c0_14 = arith.constant 0 : index
    %7 = vector.load %arg2[%c0_13, %c0_14] : memref<8x32xf32, #tpu.memory_space<vmem>>, vector<8x32xf32>
    %c0_i32 = arith.constant 0 : i32
    %8 = arith.index_cast %c0_i32 : i32 to index
    %c0_15 = arith.constant 0 : index
    %c0_16 = arith.constant 0 : index
    %9 = vector.load %arg0[%8, %c0_15, %c0_16] : memref<8x8x16xf32, #tpu.memory_space<vmem>>, vector<1x8x16xf32>
    %10 = vector.shape_cast %9 : vector<1x8x16xf32> to vector<8x16xf32>
    %11 = tpu.concatenate %10, %6 in 1 : vector<8x16xf32>, vector<8x32xf32> -> vector<8x48xf32>
    %cst = arith.constant dense<0.000000e+00> : vector<8x32xf32>
    %12 = tpu.matmul %11, %0, %cst {dimension_numbers = #tpu.dot_dimension_numbers<[1], [0], [0], [1], [0, 0, 1, 1], [], []>} : vector<8x48xf32>, vector<48x32xf32>, vector<8x32xf32> -> vector<8x32xf32>
    %13 = vector.broadcast %2 : vector<1x32xf32> to vector<8x32xf32>
    %14 = arith.addf %12, %13 : vector<8x32xf32>
    %cst_17 = arith.constant dense<0.000000e+00> : vector<8xf32>
    %15 = vector.multi_reduction <add>, %14, %cst_17 [1] : vector<8x32xf32> to vector<8xf32>
    %16 = vector.shape_cast %15 : vector<8xf32> to vector<8x1xf32>
    %cst_18 = arith.constant 3.200000e+01 : f32
    %17 = vector.broadcast %cst_18 : f32 to vector<8x1xf32>
    %18 = arith.divf %16, %17 : vector<8x1xf32>
    %19 = vector.broadcast %18 : vector<8x1xf32> to vector<8x32xf32>
    %20 = arith.subf %14, %19 : vector<8x32xf32>
    %21 = arith.mulf %20, %20 : vector<8x32xf32>
    %cst_19 = arith.constant dense<0.000000e+00> : vector<8xf32>
    %22 = vector.multi_reduction <add>, %21, %cst_19 [1] : vector<8x32xf32> to vector<8xf32>
    %23 = vector.shape_cast %22 : vector<8xf32> to vector<8x1xf32>
    %cst_20 = arith.constant 3.200000e+01 : f32
    %24 = vector.broadcast %cst_20 : f32 to vector<8x1xf32>
    %25 = arith.divf %23, %24 : vector<8x1xf32>
    %cst_21 = arith.constant 9.99999974E-6 : f32
    %26 = vector.broadcast %cst_21 : f32 to vector<8x1xf32>
    %27 = arith.addf %25, %26 : vector<8x1xf32>
    %28 = math.rsqrt %27 : vector<8x1xf32>
    %29 = vector.broadcast %18 : vector<8x1xf32> to vector<8x32xf32>
    %30 = arith.subf %14, %29 : vector<8x32xf32>
    %31 = vector.broadcast %28 : vector<8x1xf32> to vector<8x32xf32>
    %32 = arith.mulf %30, %31 : vector<8x32xf32>
    %33 = vector.broadcast %4 : vector<1x32xf32> to vector<8x32xf32>
    %34 = arith.mulf %32, %33 : vector<8x32xf32>
    %35 = vector.broadcast %5 : vector<1x32xf32> to vector<8x32xf32>
    %36 = arith.addf %34, %35 : vector<8x32xf32>
    %37 = math.tanh %36 : vector<8x32xf32>
    %38 = tpu.concatenate %37, %7 in 1 : vector<8x32xf32>, vector<8x32xf32> -> vector<8x64xf32>
    %cst_22 = arith.constant dense<0.000000e+00> : vector<8x32xf32>
    %39 = tpu.matmul %38, %1, %cst_22 {dimension_numbers = #tpu.dot_dimension_numbers<[1], [0], [0], [1], [0, 0, 1, 1], [], []>} : vector<8x64xf32>, vector<64x32xf32>, vector<8x32xf32> -> vector<8x32xf32>
    %40 = vector.broadcast %3 : vector<1x32xf32> to vector<8x32xf32>
    %41 = arith.addf %39, %40 : vector<8x32xf32>
    %cst_23 = arith.constant dense<0.000000e+00> : vector<8xf32>
    %42 = vector.multi_reduction <add>, %41, %cst_23 [1] : vector<8x32xf32> to vector<8xf32>
    %43 = vector.shape_cast %42 : vector<8xf32> to vector<8x1xf32>
    %cst_24 = arith.constant 3.200000e+01 : f32
    %44 = vector.broadcast %cst_24 : f32 to vector<8x1xf32>
    %45 = arith.divf %43, %44 : vector<8x1xf32>
    %46 = vector.broadcast %45 : vector<8x1xf32> to vector<8x32xf32>
    %47 = arith.subf %41, %46 : vector<8x32xf32>
    %48 = arith.mulf %47, %47 : vector<8x32xf32>
    %cst_25 = arith.constant dense<0.000000e+00> : vector<8xf32>
    %49 = vector.multi_reduction <add>, %48, %cst_25 [1] : vector<8x32xf32> to vector<8xf32>
    %50 = vector.shape_cast %49 : vector<8xf32> to vector<8x1xf32>
    %cst_26 = arith.constant 3.200000e+01 : f32
    %51 = vector.broadcast %cst_26 : f32 to vector<8x1xf32>
    %52 = arith.divf %50, %51 : vector<8x1xf32>
    %cst_27 = arith.constant 9.99999974E-6 : f32
    %53 = vector.broadcast %cst_27 : f32 to vector<8x1xf32>
    %54 = arith.addf %52, %53 : vector<8x1xf32>
    %55 = math.rsqrt %54 : vector<8x1xf32>
    %56 = vector.broadcast %45 : vector<8x1xf32> to vector<8x32xf32>
    %57 = arith.subf %41, %56 : vector<8x32xf32>
    %58 = vector.broadcast %55 : vector<8x1xf32> to vector<8x32xf32>
    %59 = arith.mulf %57, %58 : vector<8x32xf32>
    %60 = vector.broadcast %4 : vector<1x32xf32> to vector<8x32xf32>
    %61 = arith.mulf %59, %60 : vector<8x32xf32>
    %62 = vector.broadcast %5 : vector<1x32xf32> to vector<8x32xf32>
    %63 = arith.addf %61, %62 : vector<8x32xf32>
    %64 = math.tanh %63 : vector<8x32xf32>
    %c1_i32 = arith.constant 1 : i32
    %65 = arith.index_cast %c1_i32 : i32 to index
    %c0_28 = arith.constant 0 : index
    %c0_29 = arith.constant 0 : index
    %66 = vector.load %arg0[%65, %c0_28, %c0_29] : memref<8x8x16xf32, #tpu.memory_space<vmem>>, vector<1x8x16xf32>
    %67 = vector.shape_cast %66 : vector<1x8x16xf32> to vector<8x16xf32>
    %68 = tpu.concatenate %67, %37 in 1 : vector<8x16xf32>, vector<8x32xf32> -> vector<8x48xf32>
    %cst_30 = arith.constant dense<0.000000e+00> : vector<8x32xf32>
    %69 = tpu.matmul %68, %0, %cst_30 {dimension_numbers = #tpu.dot_dimension_numbers<[1], [0], [0], [1], [0, 0, 1, 1], [], []>} : vector<8x48xf32>, vector<48x32xf32>, vector<8x32xf32> -> vector<8x32xf32>
    %70 = vector.broadcast %2 : vector<1x32xf32> to vector<8x32xf32>
    %71 = arith.addf %69, %70 : vector<8x32xf32>
    %cst_31 = arith.constant dense<0.000000e+00> : vector<8xf32>
    %72 = vector.multi_reduction <add>, %71, %cst_31 [1] : vector<8x32xf32> to vector<8xf32>
    %73 = vector.shape_cast %72 : vector<8xf32> to vector<8x1xf32>
    %cst_32 = arith.constant 3.200000e+01 : f32
    %74 = vector.broadcast %cst_32 : f32 to vector<8x1xf32>
    %75 = arith.divf %73, %74 : vector<8x1xf32>
    %76 = vector.broadcast %75 : vector<8x1xf32> to vector<8x32xf32>
    %77 = arith.subf %71, %76 : vector<8x32xf32>
    %78 = arith.mulf %77, %77 : vector<8x32xf32>
    %cst_33 = arith.constant dense<0.000000e+00> : vector<8xf32>
    %79 = vector.multi_reduction <add>, %78, %cst_33 [1] : vector<8x32xf32> to vector<8xf32>
    %80 = vector.shape_cast %79 : vector<8xf32> to vector<8x1xf32>
    %cst_34 = arith.constant 3.200000e+01 : f32
    %81 = vector.broadcast %cst_34 : f32 to vector<8x1xf32>
    %82 = arith.divf %80, %81 : vector<8x1xf32>
    %cst_35 = arith.constant 9.99999974E-6 : f32
    %83 = vector.broadcast %cst_35 : f32 to vector<8x1xf32>
    %84 = arith.addf %82, %83 : vector<8x1xf32>
    %85 = math.rsqrt %84 : vector<8x1xf32>
    %86 = vector.broadcast %75 : vector<8x1xf32> to vector<8x32xf32>
    %87 = arith.subf %71, %86 : vector<8x32xf32>
    %88 = vector.broadcast %85 : vector<8x1xf32> to vector<8x32xf32>
    %89 = arith.mulf %87, %88 : vector<8x32xf32>
    %90 = vector.broadcast %4 : vector<1x32xf32> to vector<8x32xf32>
    %91 = arith.mulf %89, %90 : vector<8x32xf32>
    %92 = vector.broadcast %5 : vector<1x32xf32> to vector<8x32xf32>
    %93 = arith.addf %91, %92 : vector<8x32xf32>
    %94 = math.tanh %93 : vector<8x32xf32>
    %95 = tpu.concatenate %94, %64 in 1 : vector<8x32xf32>, vector<8x32xf32> -> vector<8x64xf32>
    %cst_36 = arith.constant dense<0.000000e+00> : vector<8x32xf32>
    %96 = tpu.matmul %95, %1, %cst_36 {dimension_numbers = #tpu.dot_dimension_numbers<[1], [0], [0], [1], [0, 0, 1, 1], [], []>} : vector<8x64xf32>, vector<64x32xf32>, vector<8x32xf32> -> vector<8x32xf32>
    %97 = vector.broadcast %3 : vector<1x32xf32> to vector<8x32xf32>
    %98 = arith.addf %96, %97 : vector<8x32xf32>
    %cst_37 = arith.constant dense<0.000000e+00> : vector<8xf32>
    %99 = vector.multi_reduction <add>, %98, %cst_37 [1] : vector<8x32xf32> to vector<8xf32>
    %100 = vector.shape_cast %99 : vector<8xf32> to vector<8x1xf32>
    %cst_38 = arith.constant 3.200000e+01 : f32
    %101 = vector.broadcast %cst_38 : f32 to vector<8x1xf32>
    %102 = arith.divf %100, %101 : vector<8x1xf32>
    %103 = vector.broadcast %102 : vector<8x1xf32> to vector<8x32xf32>
    %104 = arith.subf %98, %103 : vector<8x32xf32>
    %105 = arith.mulf %104, %104 : vector<8x32xf32>
    %cst_39 = arith.constant dense<0.000000e+00> : vector<8xf32>
    %106 = vector.multi_reduction <add>, %105, %cst_39 [1] : vector<8x32xf32> to vector<8xf32>
    %107 = vector.shape_cast %106 : vector<8xf32> to vector<8x1xf32>
    %cst_40 = arith.constant 3.200000e+01 : f32
    %108 = vector.broadcast %cst_40 : f32 to vector<8x1xf32>
    %109 = arith.divf %107, %108 : vector<8x1xf32>
    %cst_41 = arith.constant 9.99999974E-6 : f32
    %110 = vector.broadcast %cst_41 : f32 to vector<8x1xf32>
    %111 = arith.addf %109, %110 : vector<8x1xf32>
    %112 = math.rsqrt %111 : vector<8x1xf32>
    %113 = vector.broadcast %102 : vector<8x1xf32> to vector<8x32xf32>
    %114 = arith.subf %98, %113 : vector<8x32xf32>
    %115 = vector.broadcast %112 : vector<8x1xf32> to vector<8x32xf32>
    %116 = arith.mulf %114, %115 : vector<8x32xf32>
    %117 = vector.broadcast %4 : vector<1x32xf32> to vector<8x32xf32>
    %118 = arith.mulf %116, %117 : vector<8x32xf32>
    %119 = vector.broadcast %5 : vector<1x32xf32> to vector<8x32xf32>
    %120 = arith.addf %118, %119 : vector<8x32xf32>
    %121 = math.tanh %120 : vector<8x32xf32>
    %c2_i32 = arith.constant 2 : i32
    %122 = arith.index_cast %c2_i32 : i32 to index
    %c0_42 = arith.constant 0 : index
    %c0_43 = arith.constant 0 : index
    %123 = vector.load %arg0[%122, %c0_42, %c0_43] : memref<8x8x16xf32, #tpu.memory_space<vmem>>, vector<1x8x16xf32>
    %124 = vector.shape_cast %123 : vector<1x8x16xf32> to vector<8x16xf32>
    %125 = tpu.concatenate %124, %94 in 1 : vector<8x16xf32>, vector<8x32xf32> -> vector<8x48xf32>
    %cst_44 = arith.constant dense<0.000000e+00> : vector<8x32xf32>
    %126 = tpu.matmul %125, %0, %cst_44 {dimension_numbers = #tpu.dot_dimension_numbers<[1], [0], [0], [1], [0, 0, 1, 1], [], []>} : vector<8x48xf32>, vector<48x32xf32>, vector<8x32xf32> -> vector<8x32xf32>
    %127 = vector.broadcast %2 : vector<1x32xf32> to vector<8x32xf32>
    %128 = arith.addf %126, %127 : vector<8x32xf32>
    %cst_45 = arith.constant dense<0.000000e+00> : vector<8xf32>
    %129 = vector.multi_reduction <add>, %128, %cst_45 [1] : vector<8x32xf32> to vector<8xf32>
    %130 = vector.shape_cast %129 : vector<8xf32> to vector<8x1xf32>
    %cst_46 = arith.constant 3.200000e+01 : f32
    %131 = vector.broadcast %cst_46 : f32 to vector<8x1xf32>
    %132 = arith.divf %130, %131 : vector<8x1xf32>
    %133 = vector.broadcast %132 : vector<8x1xf32> to vector<8x32xf32>
    %134 = arith.subf %128, %133 : vector<8x32xf32>
    %135 = arith.mulf %134, %134 : vector<8x32xf32>
    %cst_47 = arith.constant dense<0.000000e+00> : vector<8xf32>
    %136 = vector.multi_reduction <add>, %135, %cst_47 [1] : vector<8x32xf32> to vector<8xf32>
    %137 = vector.shape_cast %136 : vector<8xf32> to vector<8x1xf32>
    %cst_48 = arith.constant 3.200000e+01 : f32
    %138 = vector.broadcast %cst_48 : f32 to vector<8x1xf32>
    %139 = arith.divf %137, %138 : vector<8x1xf32>
    %cst_49 = arith.constant 9.99999974E-6 : f32
    %140 = vector.broadcast %cst_49 : f32 to vector<8x1xf32>
    %141 = arith.addf %139, %140 : vector<8x1xf32>
    %142 = math.rsqrt %141 : vector<8x1xf32>
    %143 = vector.broadcast %132 : vector<8x1xf32> to vector<8x32xf32>
    %144 = arith.subf %128, %143 : vector<8x32xf32>
    %145 = vector.broadcast %142 : vector<8x1xf32> to vector<8x32xf32>
    %146 = arith.mulf %144, %145 : vector<8x32xf32>
    %147 = vector.broadcast %4 : vector<1x32xf32> to vector<8x32xf32>
    %148 = arith.mulf %146, %147 : vector<8x32xf32>
    %149 = vector.broadcast %5 : vector<1x32xf32> to vector<8x32xf32>
    %150 = arith.addf %148, %149 : vector<8x32xf32>
    %151 = math.tanh %150 : vector<8x32xf32>
    %152 = tpu.concatenate %151, %121 in 1 : vector<8x32xf32>, vector<8x32xf32> -> vector<8x64xf32>
    %cst_50 = arith.constant dense<0.000000e+00> : vector<8x32xf32>
    %153 = tpu.matmul %152, %1, %cst_50 {dimension_numbers = #tpu.dot_dimension_numbers<[1], [0], [0], [1], [0, 0, 1, 1], [], []>} : vector<8x64xf32>, vector<64x32xf32>, vector<8x32xf32> -> vector<8x32xf32>
    %154 = vector.broadcast %3 : vector<1x32xf32> to vector<8x32xf32>
    %155 = arith.addf %153, %154 : vector<8x32xf32>
    %cst_51 = arith.constant dense<0.000000e+00> : vector<8xf32>
    %156 = vector.multi_reduction <add>, %155, %cst_51 [1] : vector<8x32xf32> to vector<8xf32>
    %157 = vector.shape_cast %156 : vector<8xf32> to vector<8x1xf32>
    %cst_52 = arith.constant 3.200000e+01 : f32
    %158 = vector.broadcast %cst_52 : f32 to vector<8x1xf32>
    %159 = arith.divf %157, %158 : vector<8x1xf32>
    %160 = vector.broadcast %159 : vector<8x1xf32> to vector<8x32xf32>
    %161 = arith.subf %155, %160 : vector<8x32xf32>
    %162 = arith.mulf %161, %161 : vector<8x32xf32>
    %cst_53 = arith.constant dense<0.000000e+00> : vector<8xf32>
    %163 = vector.multi_reduction <add>, %162, %cst_53 [1] : vector<8x32xf32> to vector<8xf32>
    %164 = vector.shape_cast %163 : vector<8xf32> to vector<8x1xf32>
    %cst_54 = arith.constant 3.200000e+01 : f32
    %165 = vector.broadcast %cst_54 : f32 to vector<8x1xf32>
    %166 = arith.divf %164, %165 : vector<8x1xf32>
    %cst_55 = arith.constant 9.99999974E-6 : f32
    %167 = vector.broadcast %cst_55 : f32 to vector<8x1xf32>
    %168 = arith.addf %166, %167 : vector<8x1xf32>
    %169 = math.rsqrt %168 : vector<8x1xf32>
    %170 = vector.broadcast %159 : vector<8x1xf32> to vector<8x32xf32>
    %171 = arith.subf %155, %170 : vector<8x32xf32>
    %172 = vector.broadcast %169 : vector<8x1xf32> to vector<8x32xf32>
    %173 = arith.mulf %171, %172 : vector<8x32xf32>
    %174 = vector.broadcast %4 : vector<1x32xf32> to vector<8x32xf32>
    %175 = arith.mulf %173, %174 : vector<8x32xf32>
    %176 = vector.broadcast %5 : vector<1x32xf32> to vector<8x32xf32>
    %177 = arith.addf %175, %176 : vector<8x32xf32>
    %178 = math.tanh %177 : vector<8x32xf32>
    %c3_i32 = arith.constant 3 : i32
    %179 = arith.index_cast %c3_i32 : i32 to index
    %c0_56 = arith.constant 0 : index
    %c0_57 = arith.constant 0 : index
    %180 = vector.load %arg0[%179, %c0_56, %c0_57] : memref<8x8x16xf32, #tpu.memory_space<vmem>>, vector<1x8x16xf32>
    %181 = vector.shape_cast %180 : vector<1x8x16xf32> to vector<8x16xf32>
    %182 = tpu.concatenate %181, %151 in 1 : vector<8x16xf32>, vector<8x32xf32> -> vector<8x48xf32>
    %cst_58 = arith.constant dense<0.000000e+00> : vector<8x32xf32>
    %183 = tpu.matmul %182, %0, %cst_58 {dimension_numbers = #tpu.dot_dimension_numbers<[1], [0], [0], [1], [0, 0, 1, 1], [], []>} : vector<8x48xf32>, vector<48x32xf32>, vector<8x32xf32> -> vector<8x32xf32>
    %184 = vector.broadcast %2 : vector<1x32xf32> to vector<8x32xf32>
    %185 = arith.addf %183, %184 : vector<8x32xf32>
    %cst_59 = arith.constant dense<0.000000e+00> : vector<8xf32>
    %186 = vector.multi_reduction <add>, %185, %cst_59 [1] : vector<8x32xf32> to vector<8xf32>
    %187 = vector.shape_cast %186 : vector<8xf32> to vector<8x1xf32>
    %cst_60 = arith.constant 3.200000e+01 : f32
    %188 = vector.broadcast %cst_60 : f32 to vector<8x1xf32>
    %189 = arith.divf %187, %188 : vector<8x1xf32>
    %190 = vector.broadcast %189 : vector<8x1xf32> to vector<8x32xf32>
    %191 = arith.subf %185, %190 : vector<8x32xf32>
    %192 = arith.mulf %191, %191 : vector<8x32xf32>
    %cst_61 = arith.constant dense<0.000000e+00> : vector<8xf32>
    %193 = vector.multi_reduction <add>, %192, %cst_61 [1] : vector<8x32xf32> to vector<8xf32>
    %194 = vector.shape_cast %193 : vector<8xf32> to vector<8x1xf32>
    %cst_62 = arith.constant 3.200000e+01 : f32
    %195 = vector.broadcast %cst_62 : f32 to vector<8x1xf32>
    %196 = arith.divf %194, %195 : vector<8x1xf32>
    %cst_63 = arith.constant 9.99999974E-6 : f32
    %197 = vector.broadcast %cst_63 : f32 to vector<8x1xf32>
    %198 = arith.addf %196, %197 : vector<8x1xf32>
    %199 = math.rsqrt %198 : vector<8x1xf32>
    %200 = vector.broadcast %189 : vector<8x1xf32> to vector<8x32xf32>
    %201 = arith.subf %185, %200 : vector<8x32xf32>
    %202 = vector.broadcast %199 : vector<8x1xf32> to vector<8x32xf32>
    %203 = arith.mulf %201, %202 : vector<8x32xf32>
    %204 = vector.broadcast %4 : vector<1x32xf32> to vector<8x32xf32>
    %205 = arith.mulf %203, %204 : vector<8x32xf32>
    %206 = vector.broadcast %5 : vector<1x32xf32> to vector<8x32xf32>
    %207 = arith.addf %205, %206 : vector<8x32xf32>
    %208 = math.tanh %207 : vector<8x32xf32>
    %209 = tpu.concatenate %208, %178 in 1 : vector<8x32xf32>, vector<8x32xf32> -> vector<8x64xf32>
    %cst_64 = arith.constant dense<0.000000e+00> : vector<8x32xf32>
    %210 = tpu.matmul %209, %1, %cst_64 {dimension_numbers = #tpu.dot_dimension_numbers<[1], [0], [0], [1], [0, 0, 1, 1], [], []>} : vector<8x64xf32>, vector<64x32xf32>, vector<8x32xf32> -> vector<8x32xf32>
    %211 = vector.broadcast %3 : vector<1x32xf32> to vector<8x32xf32>
    %212 = arith.addf %210, %211 : vector<8x32xf32>
    %cst_65 = arith.constant dense<0.000000e+00> : vector<8xf32>
    %213 = vector.multi_reduction <add>, %212, %cst_65 [1] : vector<8x32xf32> to vector<8xf32>
    %214 = vector.shape_cast %213 : vector<8xf32> to vector<8x1xf32>
    %cst_66 = arith.constant 3.200000e+01 : f32
    %215 = vector.broadcast %cst_66 : f32 to vector<8x1xf32>
    %216 = arith.divf %214, %215 : vector<8x1xf32>
    %217 = vector.broadcast %216 : vector<8x1xf32> to vector<8x32xf32>
    %218 = arith.subf %212, %217 : vector<8x32xf32>
    %219 = arith.mulf %218, %218 : vector<8x32xf32>
    %cst_67 = arith.constant dense<0.000000e+00> : vector<8xf32>
    %220 = vector.multi_reduction <add>, %219, %cst_67 [1] : vector<8x32xf32> to vector<8xf32>
    %221 = vector.shape_cast %220 : vector<8xf32> to vector<8x1xf32>
    %cst_68 = arith.constant 3.200000e+01 : f32
    %222 = vector.broadcast %cst_68 : f32 to vector<8x1xf32>
    %223 = arith.divf %221, %222 : vector<8x1xf32>
    %cst_69 = arith.constant 9.99999974E-6 : f32
    %224 = vector.broadcast %cst_69 : f32 to vector<8x1xf32>
    %225 = arith.addf %223, %224 : vector<8x1xf32>
    %226 = math.rsqrt %225 : vector<8x1xf32>
    %227 = vector.broadcast %216 : vector<8x1xf32> to vector<8x32xf32>
    %228 = arith.subf %212, %227 : vector<8x32xf32>
    %229 = vector.broadcast %226 : vector<8x1xf32> to vector<8x32xf32>
    %230 = arith.mulf %228, %229 : vector<8x32xf32>
    %231 = vector.broadcast %4 : vector<1x32xf32> to vector<8x32xf32>
    %232 = arith.mulf %230, %231 : vector<8x32xf32>
    %233 = vector.broadcast %5 : vector<1x32xf32> to vector<8x32xf32>
    %234 = arith.addf %232, %233 : vector<8x32xf32>
    %235 = math.tanh %234 : vector<8x32xf32>
    %c4_i32 = arith.constant 4 : i32
    %236 = arith.index_cast %c4_i32 : i32 to index
    %c0_70 = arith.constant 0 : index
    %c0_71 = arith.constant 0 : index
    %237 = vector.load %arg0[%236, %c0_70, %c0_71] : memref<8x8x16xf32, #tpu.memory_space<vmem>>, vector<1x8x16xf32>
    %238 = vector.shape_cast %237 : vector<1x8x16xf32> to vector<8x16xf32>
    %239 = tpu.concatenate %238, %208 in 1 : vector<8x16xf32>, vector<8x32xf32> -> vector<8x48xf32>
    %cst_72 = arith.constant dense<0.000000e+00> : vector<8x32xf32>
    %240 = tpu.matmul %239, %0, %cst_72 {dimension_numbers = #tpu.dot_dimension_numbers<[1], [0], [0], [1], [0, 0, 1, 1], [], []>} : vector<8x48xf32>, vector<48x32xf32>, vector<8x32xf32> -> vector<8x32xf32>
    %241 = vector.broadcast %2 : vector<1x32xf32> to vector<8x32xf32>
    %242 = arith.addf %240, %241 : vector<8x32xf32>
    %cst_73 = arith.constant dense<0.000000e+00> : vector<8xf32>
    %243 = vector.multi_reduction <add>, %242, %cst_73 [1] : vector<8x32xf32> to vector<8xf32>
    %244 = vector.shape_cast %243 : vector<8xf32> to vector<8x1xf32>
    %cst_74 = arith.constant 3.200000e+01 : f32
    %245 = vector.broadcast %cst_74 : f32 to vector<8x1xf32>
    %246 = arith.divf %244, %245 : vector<8x1xf32>
    %247 = vector.broadcast %246 : vector<8x1xf32> to vector<8x32xf32>
    %248 = arith.subf %242, %247 : vector<8x32xf32>
    %249 = arith.mulf %248, %248 : vector<8x32xf32>
    %cst_75 = arith.constant dense<0.000000e+00> : vector<8xf32>
    %250 = vector.multi_reduction <add>, %249, %cst_75 [1] : vector<8x32xf32> to vector<8xf32>
    %251 = vector.shape_cast %250 : vector<8xf32> to vector<8x1xf32>
    %cst_76 = arith.constant 3.200000e+01 : f32
    %252 = vector.broadcast %cst_76 : f32 to vector<8x1xf32>
    %253 = arith.divf %251, %252 : vector<8x1xf32>
    %cst_77 = arith.constant 9.99999974E-6 : f32
    %254 = vector.broadcast %cst_77 : f32 to vector<8x1xf32>
    %255 = arith.addf %253, %254 : vector<8x1xf32>
    %256 = math.rsqrt %255 : vector<8x1xf32>
    %257 = vector.broadcast %246 : vector<8x1xf32> to vector<8x32xf32>
    %258 = arith.subf %242, %257 : vector<8x32xf32>
    %259 = vector.broadcast %256 : vector<8x1xf32> to vector<8x32xf32>
    %260 = arith.mulf %258, %259 : vector<8x32xf32>
    %261 = vector.broadcast %4 : vector<1x32xf32> to vector<8x32xf32>
    %262 = arith.mulf %260, %261 : vector<8x32xf32>
    %263 = vector.broadcast %5 : vector<1x32xf32> to vector<8x32xf32>
    %264 = arith.addf %262, %263 : vector<8x32xf32>
    %265 = math.tanh %264 : vector<8x32xf32>
    %266 = tpu.concatenate %265, %235 in 1 : vector<8x32xf32>, vector<8x32xf32> -> vector<8x64xf32>
    %cst_78 = arith.constant dense<0.000000e+00> : vector<8x32xf32>
    %267 = tpu.matmul %266, %1, %cst_78 {dimension_numbers = #tpu.dot_dimension_numbers<[1], [0], [0], [1], [0, 0, 1, 1], [], []>} : vector<8x64xf32>, vector<64x32xf32>, vector<8x32xf32> -> vector<8x32xf32>
    %268 = vector.broadcast %3 : vector<1x32xf32> to vector<8x32xf32>
    %269 = arith.addf %267, %268 : vector<8x32xf32>
    %cst_79 = arith.constant dense<0.000000e+00> : vector<8xf32>
    %270 = vector.multi_reduction <add>, %269, %cst_79 [1] : vector<8x32xf32> to vector<8xf32>
    %271 = vector.shape_cast %270 : vector<8xf32> to vector<8x1xf32>
    %cst_80 = arith.constant 3.200000e+01 : f32
    %272 = vector.broadcast %cst_80 : f32 to vector<8x1xf32>
    %273 = arith.divf %271, %272 : vector<8x1xf32>
    %274 = vector.broadcast %273 : vector<8x1xf32> to vector<8x32xf32>
    %275 = arith.subf %269, %274 : vector<8x32xf32>
    %276 = arith.mulf %275, %275 : vector<8x32xf32>
    %cst_81 = arith.constant dense<0.000000e+00> : vector<8xf32>
    %277 = vector.multi_reduction <add>, %276, %cst_81 [1] : vector<8x32xf32> to vector<8xf32>
    %278 = vector.shape_cast %277 : vector<8xf32> to vector<8x1xf32>
    %cst_82 = arith.constant 3.200000e+01 : f32
    %279 = vector.broadcast %cst_82 : f32 to vector<8x1xf32>
    %280 = arith.divf %278, %279 : vector<8x1xf32>
    %cst_83 = arith.constant 9.99999974E-6 : f32
    %281 = vector.broadcast %cst_83 : f32 to vector<8x1xf32>
    %282 = arith.addf %280, %281 : vector<8x1xf32>
    %283 = math.rsqrt %282 : vector<8x1xf32>
    %284 = vector.broadcast %273 : vector<8x1xf32> to vector<8x32xf32>
    %285 = arith.subf %269, %284 : vector<8x32xf32>
    %286 = vector.broadcast %283 : vector<8x1xf32> to vector<8x32xf32>
    %287 = arith.mulf %285, %286 : vector<8x32xf32>
    %288 = vector.broadcast %4 : vector<1x32xf32> to vector<8x32xf32>
    %289 = arith.mulf %287, %288 : vector<8x32xf32>
    %290 = vector.broadcast %5 : vector<1x32xf32> to vector<8x32xf32>
    %291 = arith.addf %289, %290 : vector<8x32xf32>
    %292 = math.tanh %291 : vector<8x32xf32>
    %c5_i32 = arith.constant 5 : i32
    %293 = arith.index_cast %c5_i32 : i32 to index
    %c0_84 = arith.constant 0 : index
    %c0_85 = arith.constant 0 : index
    %294 = vector.load %arg0[%293, %c0_84, %c0_85] : memref<8x8x16xf32, #tpu.memory_space<vmem>>, vector<1x8x16xf32>
    %295 = vector.shape_cast %294 : vector<1x8x16xf32> to vector<8x16xf32>
    %296 = tpu.concatenate %295, %265 in 1 : vector<8x16xf32>, vector<8x32xf32> -> vector<8x48xf32>
    %cst_86 = arith.constant dense<0.000000e+00> : vector<8x32xf32>
    %297 = tpu.matmul %296, %0, %cst_86 {dimension_numbers = #tpu.dot_dimension_numbers<[1], [0], [0], [1], [0, 0, 1, 1], [], []>} : vector<8x48xf32>, vector<48x32xf32>, vector<8x32xf32> -> vector<8x32xf32>
    %298 = vector.broadcast %2 : vector<1x32xf32> to vector<8x32xf32>
    %299 = arith.addf %297, %298 : vector<8x32xf32>
    %cst_87 = arith.constant dense<0.000000e+00> : vector<8xf32>
    %300 = vector.multi_reduction <add>, %299, %cst_87 [1] : vector<8x32xf32> to vector<8xf32>
    %301 = vector.shape_cast %300 : vector<8xf32> to vector<8x1xf32>
    %cst_88 = arith.constant 3.200000e+01 : f32
    %302 = vector.broadcast %cst_88 : f32 to vector<8x1xf32>
    %303 = arith.divf %301, %302 : vector<8x1xf32>
    %304 = vector.broadcast %303 : vector<8x1xf32> to vector<8x32xf32>
    %305 = arith.subf %299, %304 : vector<8x32xf32>
    %306 = arith.mulf %305, %305 : vector<8x32xf32>
    %cst_89 = arith.constant dense<0.000000e+00> : vector<8xf32>
    %307 = vector.multi_reduction <add>, %306, %cst_89 [1] : vector<8x32xf32> to vector<8xf32>
    %308 = vector.shape_cast %307 : vector<8xf32> to vector<8x1xf32>
    %cst_90 = arith.constant 3.200000e+01 : f32
    %309 = vector.broadcast %cst_90 : f32 to vector<8x1xf32>
    %310 = arith.divf %308, %309 : vector<8x1xf32>
    %cst_91 = arith.constant 9.99999974E-6 : f32
    %311 = vector.broadcast %cst_91 : f32 to vector<8x1xf32>
    %312 = arith.addf %310, %311 : vector<8x1xf32>
    %313 = math.rsqrt %312 : vector<8x1xf32>
    %314 = vector.broadcast %303 : vector<8x1xf32> to vector<8x32xf32>
    %315 = arith.subf %299, %314 : vector<8x32xf32>
    %316 = vector.broadcast %313 : vector<8x1xf32> to vector<8x32xf32>
    %317 = arith.mulf %315, %316 : vector<8x32xf32>
    %318 = vector.broadcast %4 : vector<1x32xf32> to vector<8x32xf32>
    %319 = arith.mulf %317, %318 : vector<8x32xf32>
    %320 = vector.broadcast %5 : vector<1x32xf32> to vector<8x32xf32>
    %321 = arith.addf %319, %320 : vector<8x32xf32>
    %322 = math.tanh %321 : vector<8x32xf32>
    %323 = tpu.concatenate %322, %292 in 1 : vector<8x32xf32>, vector<8x32xf32> -> vector<8x64xf32>
    %cst_92 = arith.constant dense<0.000000e+00> : vector<8x32xf32>
    %324 = tpu.matmul %323, %1, %cst_92 {dimension_numbers = #tpu.dot_dimension_numbers<[1], [0], [0], [1], [0, 0, 1, 1], [], []>} : vector<8x64xf32>, vector<64x32xf32>, vector<8x32xf32> -> vector<8x32xf32>
    %325 = vector.broadcast %3 : vector<1x32xf32> to vector<8x32xf32>
    %326 = arith.addf %324, %325 : vector<8x32xf32>
    %cst_93 = arith.constant dense<0.000000e+00> : vector<8xf32>
    %327 = vector.multi_reduction <add>, %326, %cst_93 [1] : vector<8x32xf32> to vector<8xf32>
    %328 = vector.shape_cast %327 : vector<8xf32> to vector<8x1xf32>
    %cst_94 = arith.constant 3.200000e+01 : f32
    %329 = vector.broadcast %cst_94 : f32 to vector<8x1xf32>
    %330 = arith.divf %328, %329 : vector<8x1xf32>
    %331 = vector.broadcast %330 : vector<8x1xf32> to vector<8x32xf32>
    %332 = arith.subf %326, %331 : vector<8x32xf32>
    %333 = arith.mulf %332, %332 : vector<8x32xf32>
    %cst_95 = arith.constant dense<0.000000e+00> : vector<8xf32>
    %334 = vector.multi_reduction <add>, %333, %cst_95 [1] : vector<8x32xf32> to vector<8xf32>
    %335 = vector.shape_cast %334 : vector<8xf32> to vector<8x1xf32>
    %cst_96 = arith.constant 3.200000e+01 : f32
    %336 = vector.broadcast %cst_96 : f32 to vector<8x1xf32>
    %337 = arith.divf %335, %336 : vector<8x1xf32>
    %cst_97 = arith.constant 9.99999974E-6 : f32
    %338 = vector.broadcast %cst_97 : f32 to vector<8x1xf32>
    %339 = arith.addf %337, %338 : vector<8x1xf32>
    %340 = math.rsqrt %339 : vector<8x1xf32>
    %341 = vector.broadcast %330 : vector<8x1xf32> to vector<8x32xf32>
    %342 = arith.subf %326, %341 : vector<8x32xf32>
    %343 = vector.broadcast %340 : vector<8x1xf32> to vector<8x32xf32>
    %344 = arith.mulf %342, %343 : vector<8x32xf32>
    %345 = vector.broadcast %4 : vector<1x32xf32> to vector<8x32xf32>
    %346 = arith.mulf %344, %345 : vector<8x32xf32>
    %347 = vector.broadcast %5 : vector<1x32xf32> to vector<8x32xf32>
    %348 = arith.addf %346, %347 : vector<8x32xf32>
    %349 = math.tanh %348 : vector<8x32xf32>
    %c6_i32 = arith.constant 6 : i32
    %350 = arith.index_cast %c6_i32 : i32 to index
    %c0_98 = arith.constant 0 : index
    %c0_99 = arith.constant 0 : index
    %351 = vector.load %arg0[%350, %c0_98, %c0_99] : memref<8x8x16xf32, #tpu.memory_space<vmem>>, vector<1x8x16xf32>
    %352 = vector.shape_cast %351 : vector<1x8x16xf32> to vector<8x16xf32>
    %353 = tpu.concatenate %352, %322 in 1 : vector<8x16xf32>, vector<8x32xf32> -> vector<8x48xf32>
    %cst_100 = arith.constant dense<0.000000e+00> : vector<8x32xf32>
    %354 = tpu.matmul %353, %0, %cst_100 {dimension_numbers = #tpu.dot_dimension_numbers<[1], [0], [0], [1], [0, 0, 1, 1], [], []>} : vector<8x48xf32>, vector<48x32xf32>, vector<8x32xf32> -> vector<8x32xf32>
    %355 = vector.broadcast %2 : vector<1x32xf32> to vector<8x32xf32>
    %356 = arith.addf %354, %355 : vector<8x32xf32>
    %cst_101 = arith.constant dense<0.000000e+00> : vector<8xf32>
    %357 = vector.multi_reduction <add>, %356, %cst_101 [1] : vector<8x32xf32> to vector<8xf32>
    %358 = vector.shape_cast %357 : vector<8xf32> to vector<8x1xf32>
    %cst_102 = arith.constant 3.200000e+01 : f32
    %359 = vector.broadcast %cst_102 : f32 to vector<8x1xf32>
    %360 = arith.divf %358, %359 : vector<8x1xf32>
    %361 = vector.broadcast %360 : vector<8x1xf32> to vector<8x32xf32>
    %362 = arith.subf %356, %361 : vector<8x32xf32>
    %363 = arith.mulf %362, %362 : vector<8x32xf32>
    %cst_103 = arith.constant dense<0.000000e+00> : vector<8xf32>
    %364 = vector.multi_reduction <add>, %363, %cst_103 [1] : vector<8x32xf32> to vector<8xf32>
    %365 = vector.shape_cast %364 : vector<8xf32> to vector<8x1xf32>
    %cst_104 = arith.constant 3.200000e+01 : f32
    %366 = vector.broadcast %cst_104 : f32 to vector<8x1xf32>
    %367 = arith.divf %365, %366 : vector<8x1xf32>
    %cst_105 = arith.constant 9.99999974E-6 : f32
    %368 = vector.broadcast %cst_105 : f32 to vector<8x1xf32>
    %369 = arith.addf %367, %368 : vector<8x1xf32>
    %370 = math.rsqrt %369 : vector<8x1xf32>
    %371 = vector.broadcast %360 : vector<8x1xf32> to vector<8x32xf32>
    %372 = arith.subf %356, %371 : vector<8x32xf32>
    %373 = vector.broadcast %370 : vector<8x1xf32> to vector<8x32xf32>
    %374 = arith.mulf %372, %373 : vector<8x32xf32>
    %375 = vector.broadcast %4 : vector<1x32xf32> to vector<8x32xf32>
    %376 = arith.mulf %374, %375 : vector<8x32xf32>
    %377 = vector.broadcast %5 : vector<1x32xf32> to vector<8x32xf32>
    %378 = arith.addf %376, %377 : vector<8x32xf32>
    %379 = math.tanh %378 : vector<8x32xf32>
    %380 = tpu.concatenate %379, %349 in 1 : vector<8x32xf32>, vector<8x32xf32> -> vector<8x64xf32>
    %cst_106 = arith.constant dense<0.000000e+00> : vector<8x32xf32>
    %381 = tpu.matmul %380, %1, %cst_106 {dimension_numbers = #tpu.dot_dimension_numbers<[1], [0], [0], [1], [0, 0, 1, 1], [], []>} : vector<8x64xf32>, vector<64x32xf32>, vector<8x32xf32> -> vector<8x32xf32>
    %382 = vector.broadcast %3 : vector<1x32xf32> to vector<8x32xf32>
    %383 = arith.addf %381, %382 : vector<8x32xf32>
    %cst_107 = arith.constant dense<0.000000e+00> : vector<8xf32>
    %384 = vector.multi_reduction <add>, %383, %cst_107 [1] : vector<8x32xf32> to vector<8xf32>
    %385 = vector.shape_cast %384 : vector<8xf32> to vector<8x1xf32>
    %cst_108 = arith.constant 3.200000e+01 : f32
    %386 = vector.broadcast %cst_108 : f32 to vector<8x1xf32>
    %387 = arith.divf %385, %386 : vector<8x1xf32>
    %388 = vector.broadcast %387 : vector<8x1xf32> to vector<8x32xf32>
    %389 = arith.subf %383, %388 : vector<8x32xf32>
    %390 = arith.mulf %389, %389 : vector<8x32xf32>
    %cst_109 = arith.constant dense<0.000000e+00> : vector<8xf32>
    %391 = vector.multi_reduction <add>, %390, %cst_109 [1] : vector<8x32xf32> to vector<8xf32>
    %392 = vector.shape_cast %391 : vector<8xf32> to vector<8x1xf32>
    %cst_110 = arith.constant 3.200000e+01 : f32
    %393 = vector.broadcast %cst_110 : f32 to vector<8x1xf32>
    %394 = arith.divf %392, %393 : vector<8x1xf32>
    %cst_111 = arith.constant 9.99999974E-6 : f32
    %395 = vector.broadcast %cst_111 : f32 to vector<8x1xf32>
    %396 = arith.addf %394, %395 : vector<8x1xf32>
    %397 = math.rsqrt %396 : vector<8x1xf32>
    %398 = vector.broadcast %387 : vector<8x1xf32> to vector<8x32xf32>
    %399 = arith.subf %383, %398 : vector<8x32xf32>
    %400 = vector.broadcast %397 : vector<8x1xf32> to vector<8x32xf32>
    %401 = arith.mulf %399, %400 : vector<8x32xf32>
    %402 = vector.broadcast %4 : vector<1x32xf32> to vector<8x32xf32>
    %403 = arith.mulf %401, %402 : vector<8x32xf32>
    %404 = vector.broadcast %5 : vector<1x32xf32> to vector<8x32xf32>
    %405 = arith.addf %403, %404 : vector<8x32xf32>
    %406 = math.tanh %405 : vector<8x32xf32>
    %c7_i32 = arith.constant 7 : i32
    %407 = arith.index_cast %c7_i32 : i32 to index
    %c0_112 = arith.constant 0 : index
    %c0_113 = arith.constant 0 : index
    %408 = vector.load %arg0[%407, %c0_112, %c0_113] : memref<8x8x16xf32, #tpu.memory_space<vmem>>, vector<1x8x16xf32>
    %409 = vector.shape_cast %408 : vector<1x8x16xf32> to vector<8x16xf32>
    %410 = tpu.concatenate %409, %379 in 1 : vector<8x16xf32>, vector<8x32xf32> -> vector<8x48xf32>
    %cst_114 = arith.constant dense<0.000000e+00> : vector<8x32xf32>
    %411 = tpu.matmul %410, %0, %cst_114 {dimension_numbers = #tpu.dot_dimension_numbers<[1], [0], [0], [1], [0, 0, 1, 1], [], []>} : vector<8x48xf32>, vector<48x32xf32>, vector<8x32xf32> -> vector<8x32xf32>
    %412 = vector.broadcast %2 : vector<1x32xf32> to vector<8x32xf32>
    %413 = arith.addf %411, %412 : vector<8x32xf32>
    %cst_115 = arith.constant dense<0.000000e+00> : vector<8xf32>
    %414 = vector.multi_reduction <add>, %413, %cst_115 [1] : vector<8x32xf32> to vector<8xf32>
    %415 = vector.shape_cast %414 : vector<8xf32> to vector<8x1xf32>
    %cst_116 = arith.constant 3.200000e+01 : f32
    %416 = vector.broadcast %cst_116 : f32 to vector<8x1xf32>
    %417 = arith.divf %415, %416 : vector<8x1xf32>
    %418 = vector.broadcast %417 : vector<8x1xf32> to vector<8x32xf32>
    %419 = arith.subf %413, %418 : vector<8x32xf32>
    %420 = arith.mulf %419, %419 : vector<8x32xf32>
    %cst_117 = arith.constant dense<0.000000e+00> : vector<8xf32>
    %421 = vector.multi_reduction <add>, %420, %cst_117 [1] : vector<8x32xf32> to vector<8xf32>
    %422 = vector.shape_cast %421 : vector<8xf32> to vector<8x1xf32>
    %cst_118 = arith.constant 3.200000e+01 : f32
    %423 = vector.broadcast %cst_118 : f32 to vector<8x1xf32>
    %424 = arith.divf %422, %423 : vector<8x1xf32>
    %cst_119 = arith.constant 9.99999974E-6 : f32
    %425 = vector.broadcast %cst_119 : f32 to vector<8x1xf32>
    %426 = arith.addf %424, %425 : vector<8x1xf32>
    %427 = math.rsqrt %426 : vector<8x1xf32>
    %428 = vector.broadcast %417 : vector<8x1xf32> to vector<8x32xf32>
    %429 = arith.subf %413, %428 : vector<8x32xf32>
    %430 = vector.broadcast %427 : vector<8x1xf32> to vector<8x32xf32>
    %431 = arith.mulf %429, %430 : vector<8x32xf32>
    %432 = vector.broadcast %4 : vector<1x32xf32> to vector<8x32xf32>
    %433 = arith.mulf %431, %432 : vector<8x32xf32>
    %434 = vector.broadcast %5 : vector<1x32xf32> to vector<8x32xf32>
    %435 = arith.addf %433, %434 : vector<8x32xf32>
    %436 = math.tanh %435 : vector<8x32xf32>
    %437 = tpu.concatenate %436, %406 in 1 : vector<8x32xf32>, vector<8x32xf32> -> vector<8x64xf32>
    %cst_120 = arith.constant dense<0.000000e+00> : vector<8x32xf32>
    %438 = tpu.matmul %437, %1, %cst_120 {dimension_numbers = #tpu.dot_dimension_numbers<[1], [0], [0], [1], [0, 0, 1, 1], [], []>} : vector<8x64xf32>, vector<64x32xf32>, vector<8x32xf32> -> vector<8x32xf32>
    %439 = vector.broadcast %3 : vector<1x32xf32> to vector<8x32xf32>
    %440 = arith.addf %438, %439 : vector<8x32xf32>
    %cst_121 = arith.constant dense<0.000000e+00> : vector<8xf32>
    %441 = vector.multi_reduction <add>, %440, %cst_121 [1] : vector<8x32xf32> to vector<8xf32>
    %442 = vector.shape_cast %441 : vector<8xf32> to vector<8x1xf32>
    %cst_122 = arith.constant 3.200000e+01 : f32
    %443 = vector.broadcast %cst_122 : f32 to vector<8x1xf32>
    %444 = arith.divf %442, %443 : vector<8x1xf32>
    %445 = vector.broadcast %444 : vector<8x1xf32> to vector<8x32xf32>
    %446 = arith.subf %440, %445 : vector<8x32xf32>
    %447 = arith.mulf %446, %446 : vector<8x32xf32>
    %cst_123 = arith.constant dense<0.000000e+00> : vector<8xf32>
    %448 = vector.multi_reduction <add>, %447, %cst_123 [1] : vector<8x32xf32> to vector<8xf32>
    %449 = vector.shape_cast %448 : vector<8xf32> to vector<8x1xf32>
    %cst_124 = arith.constant 3.200000e+01 : f32
    %450 = vector.broadcast %cst_124 : f32 to vector<8x1xf32>
    %451 = arith.divf %449, %450 : vector<8x1xf32>
    %cst_125 = arith.constant 9.99999974E-6 : f32
    %452 = vector.broadcast %cst_125 : f32 to vector<8x1xf32>
    %453 = arith.addf %451, %452 : vector<8x1xf32>
    %454 = math.rsqrt %453 : vector<8x1xf32>
    %455 = vector.broadcast %444 : vector<8x1xf32> to vector<8x32xf32>
    %456 = arith.subf %440, %455 : vector<8x32xf32>
    %457 = vector.broadcast %454 : vector<8x1xf32> to vector<8x32xf32>
    %458 = arith.mulf %456, %457 : vector<8x32xf32>
    %459 = vector.broadcast %4 : vector<1x32xf32> to vector<8x32xf32>
    %460 = arith.mulf %458, %459 : vector<8x32xf32>
    %461 = vector.broadcast %5 : vector<1x32xf32> to vector<8x32xf32>
    %462 = arith.addf %460, %461 : vector<8x32xf32>
    %463 = math.tanh %462 : vector<8x32xf32>
    %c8_i32 = arith.constant 8 : i32
    %c0_126 = arith.constant 0 : index
    %c0_127 = arith.constant 0 : index
    %464 = vector.load %arg9[%c0_126, %c0_127] : memref<8x32xf32, #tpu.memory_space<vmem>>, vector<8x32xf32>
    tpu.vector_store %arg9[%c0_126, %c0_127], %463 {strides = array<i32>} : memref<8x32xf32, #tpu.memory_space<vmem>>, vector<8x32xf32>,
    return
  }
}

</mosaic_0001>

<bundles_post_ra>
// kernel: tpu_custom_call.1
= control target key start
LH: loop header
LB: loop body
LE: loop exit
PB: predicated region body
PF: predicated region fallthrough
CT: control target
= control target key end

     0   :  { %s2305_s15 = smov 16   ;;  %v2306_v3 = vmov 0.0|0.0   ;;  %vm2307_vm0 = vmmov 0   ;;  %v2308_v7 = vmov 0.0   ;;  %s2752_s0 = inlined_call_operand.vmem [shape: f32[8,8,16], index: 0, kind: input, shape index: {}]   ;;  %s2753_s1 = inlined_call_operand.vmem [shape: f32[8,32], index: 1, kind: input, shape index: {}]   ;;  %s2754_s2 = inlined_call_operand.vmem [shape: f32[8,32], index: 2, kind: input, shape index: {}]   ;;  %s2755_s3 = inlined_call_operand.vmem [shape: f32[48,32], index: 3, kind: input, shape index: {}]   ;;  %s2756_s4 = inlined_call_operand.vmem [shape: f32[1,32], index: 4, kind: input, shape index: {}]   ;;  %s2757_s5 = inlined_call_operand.vmem [shape: f32[64,32], index: 5, kind: input, shape index: {}]   ;;  %s2758_s6 = inlined_call_operand.vmem [shape: f32[1,32], index: 6, kind: input, shape index: {}]   ;;  %s2759_s7 = inlined_call_operand.vmem [shape: f32[1,32], index: 7, kind: input, shape index: {}]   ;;  %s2760_s8 = inlined_call_operand.vmem [shape: f32[1,32], index: 8, kind: input, shape index: {}]   ;;  %s2761_s9 = inlined_call_operand.hbm [shape: f32[8,32], index: 9, kind: output, shape index: {}]  }
   0x1   :  { %v51_v0 = vld [vmem:[%s2753_s1] sm:$0xff]  ;;  %v34_v2 = vld [vmem:[%s2755_s3 + $0x8] sm:$0xff]  ;;  %2043 = vmatprep.subr.bf16.mxu1 %v2306_v3  ;;  %v35_v5 = vld [vmem:[%s2755_s3 + $0x10] sm:$0xff]  ;;  %1783 = vmatprep.mubr.msk.f32.mxu1 %vm2307_vm0, %v2308_v7 }
   0x2   :  { %v33_v1 = vld [vmem:[%s2755_s3] sm:$0xff]  ;;  %55 = vrot.lane.b32.xlu0 %v51_v0, %s2305_s15  ;;  %v36_v6 = vld [vmem:[%s2755_s3 + $0x18] sm:$0xff]  ;;  %2064 = vmatprep.subr.bf16.mxu0 %v2306_v3 }
   0x3   :  { %v2372_v4 = vpack.c.bf16 %v34_v2, %v33_v1  ;;  %v2384_v8 = vpack.c.bf16 %v36_v6, %v35_v5 }
   0x5   :  { %2045 = vmatpush3.bf16.msra.mxu1 %v2372_v4  ;;  %2066 = vmatpush3.bf16.msra.mxu0 %v2372_v4 }
   0x6   :  { %14 = vsyncpa [#allocation3], 0  ;;  %2046 = vmatprep.subr.bf16.mxu1 %v2306_v3  ;;  %v37_v9 = vld [vmem:[%s2755_s3 + $0x20] sm:$0xff]  ;;  %v38_v10 = vld [vmem:[%s2755_s3 + $0x28] sm:$0xff]  ;;  %2067 = vmatprep.subr.bf16.mxu0 %v2306_v3  ;;  %vm58_vm1 = vcmask 130048   ;;  %vm66_vm2 = vcmask 392192  }
   0x7   :  { %1817 = vmatprep.mubr.msk.f32.mxu0 %vm2307_vm0, %v2308_v7  ;;  %v2398_v11 = vpack.c.bf16 %v38_v10, %v37_v9  ;;  %v53_v12 = vld [vmem:[%s2752_s0] sm:$0xff]  ;;  %vm140_vm3 = vcmask 261120   ;;  %v40_v27 = vld [vmem:[%s2757_s5 + $0x8] sm:$0xff]  ;;  %v41_v29 = vld [vmem:[%s2757_s5 + $0x10] sm:$0xff]  ;;  %vm181_vm4 = vcmask 523264  }
   0x8   :  { %v2417_v15 = vld [vmem:[%s2756_s4] ss:$0 sm:$0xff]  ;;  %s2309_s4 = smov 32   ;;  %v42_v30 = vld [vmem:[%s2757_s5 + $0x18] sm:$0xff]  ;;  %v44_v33 = vld [vmem:[%s2757_s5 + $0x28] sm:$0xff] }
   0x9   :  { %2048 = vmatpush3.bf16.msra.mxu1 %v2384_v8  ;;  %2069 = vmatpush3.bf16.msra.mxu0 %v2384_v8  ;;  %v52_v25 = vld [vmem:[%s2754_s2] sm:$0xff]  ;;  %v2442_v31 = vpack.c.bf16 %v42_v30, %v41_v29  ;;  %v45_v35 = vld [vmem:[%s2757_s5 + $0x30] sm:$0xff]  ;;  %v46_v36 = vld [vmem:[%s2757_s5 + $0x38] sm:$0xff] }
   0xa   :  { %2049 = vmatprep.subr.bf16.mxu1 %v2306_v3  ;;  %2070 = vmatprep.subr.bf16.mxu0 %v2306_v3  ;;  %v39_v26 = vld [vmem:[%s2757_s5] sm:$0xff]  ;;  %v2461_v37 = vpack.c.bf16 %v46_v36, %v45_v35  ;;  %v1622_v50 = vld [vmem:[%s2752_s0 + $0x8] sm:$0xff]  ;;  %v1625_v35 = vld [vmem:[%s2752_s0 + $0x10] sm:$0xff] }
   0xb   :  { %v2432_v28 = vpack.c.bf16 %v40_v27, %v39_v26  ;;  %v43_v32 = vld [vmem:[%s2757_s5 + $0x20] sm:$0xff] }
   0xc   :  { %v2451_v34 = vpack.c.bf16 %v44_v33, %v43_v32  ;;  %v2469_v42 = vld [vmem:[%s2759_s7] ss:$0 sm:$0xff] }
   0xd   :  { %2051 = vmatpush3.bf16.msra.mxu1 %v2398_v11  ;;  %2072 = vmatpush3.bf16.msra.mxu0 %v2398_v11  ;;  %v2474_v44 = vld [vmem:[%s2760_s8] ss:$0 sm:$0xff] }
   0xe   :  { %2052 = vmatprep.subr.bf16.mxu1 %v2306_v3  ;;  %2085 = vmatprep.subr.bf16.mxu0 %v2306_v3  ;;  %v2507_v53 = vld [vmem:[%s2758_s6] ss:$0 sm:$0xff] }
  0x74   :  { %v56_v13 = vpop.permute.xlu0 %55 }
  0x75   :  { %v59_v14 = vsel %vm58_vm1, %v53_v12, %v56_v13 }
  0x76   :  { %1784 = vmatmul.mubr.msk.f32.vlgmr.msra.gmra.mrb[0].mxu1 %vm66_vm2, %v59_v14 }
  0x77   :  { %1802 = vmatprep.mubr.msk.f32.mxu1 %vm2307_vm0, %v2308_v7  ;;  %2054 = vmatpush3.bf16.msra.mxu1 %v2432_v28 }
  0x78   :  { %2055 = vmatprep.subr.bf16.mxu1 %v2306_v3 }
  0x7b   :  { %2057 = vmatpush3.bf16.msra.mxu1 %v2442_v31 }
  0x7c   :  { %2058 = vmatprep.subr.bf16.mxu1 %v2306_v3 }
  0x7f   :  { %2060 = vmatpush3.bf16.msra.mxu1 %v2451_v34 }
  0x80   :  { %2061 = vmatprep.subr.bf16.mxu1 %v2306_v3 }
  0x83   :  { %2063 = vmatpush3.bf16.msra.mxu1 %v2461_v37 }
  0x84   :  { %2073 = vmatprep.subr.bf16.mxu1 %v2306_v3 }
 0x149   :  { %v136_v16 = vpop.f32.mrb[0].mxu1 }
 0x14a   :  { %v137_v17 = vadd.f32 %v2417_v15, %v136_v16  ;;  %v1785_v18 = vpop.f32.mrb[1].mxu1 }
 0x14c   :  { %v141_v19 = vsel %vm140_vm3, %v137_v17, 0.0 }
 0x14d   :  { %142 = vadd.xlane.f32.xlu0 %v141_v19 }
 0x1da   :  { %v143_v20 = vpop.xlane.xlu0 %142 }
 0x1db   :  { %v145_v21 = vmul.f32 0.03125, %v143_v20 }
 0x1dd   :  { %v146_v22 = vsub.f32 %v137_v17, %v145_v21 }
 0x1df   :  { %v147_v23 = vmul.f32 %v146_v22, %v146_v22 }
 0x1e1   :  { %v148_v24 = vsel %vm140_vm3, %v147_v23, 0.0 }
 0x1e2   :  { %149 = vadd.xlane.f32.xlu1 %v148_v24 }
 0x1f3   :  { %171 = vrot.lane.b32.xlu1 %v52_v25, %s2309_s4 }
 0x26f   :  { %v150_v38 = vpop.xlane.xlu1 %149 }
 0x270   :  { %v151_v39 = vmul.f32 0.03125, %v150_v38 }
 0x272   :  { %v152_v40 = vadd.f32 1e-05, %v151_v39 }
 0x273   :  { %v172_v47 = vpop.permute.xlu1 %171 }
 0x274   :  { %2217 = vrsqrt.f32 %v152_v40 }
 0x27e   :  { %v2218_v41 = vpop.eup %2217 }
 0x27f   :  { %v154_v43 = vmul.f32 %v2218_v41, %v146_v22 }
 0x281   :  { %v161_v45 = vmul.f32 %v2469_v42, %v154_v43 }
 0x283   :  { %v168_v46 = vadd.f32 %v2474_v44, %v161_v45 }
 0x285   :  { %2219 = vtanh.f32 %v168_v46 }
 0x28f   :  { %v2220_v48 = vpop.eup %2219 }
 0x290   :  { %v174_v49 = vsel %vm140_vm3, %v2220_v48, %v172_v47  ;;  %274 = vrot.lane.b32.xlu1 %v2220_v48, %s2305_s15 }
 0x291   :  { %1803 = vmatmul.mubr.msk.f32.vlgmr.msra.gmra.mrb[2].mxu1 %vm181_vm4, %v174_v49 }
 0x292   :  { %2075 = vmatpush3.bf16.msra.mxu1 %v2432_v28  ;;  %1836 = vmatprep.mubr.msk.f32.mxu1 %vm2307_vm0, %v2308_v7 }
 0x293   :  { %2076 = vmatprep.subr.bf16.mxu1 %v2306_v3 }
 0x296   :  { %2078 = vmatpush3.bf16.msra.mxu1 %v2442_v31 }
 0x297   :  { %2079 = vmatprep.subr.bf16.mxu1 %v2306_v3 }
 0x29a   :  { %2081 = vmatpush3.bf16.msra.mxu1 %v2451_v34 }
 0x29b   :  { %2082 = vmatprep.subr.bf16.mxu1 %v2306_v3 }
 0x29e   :  { %2084 = vmatpush3.bf16.msra.mxu1 %v2461_v37 }
 0x29f   :  { %2094 = vmatprep.subr.bf16.mxu1 %v2306_v3 }
 0x302   :  { %v275_v51 = vpop.permute.xlu1 %274 }
 0x303   :  { %v277_v52 = vsel %vm58_vm1, %v1622_v50, %v275_v51 }
 0x304   :  { %1818 = vmatmul.mubr.msk.f32.vlgmr.msra.gmra.mrb[0].mxu0 %vm66_vm2, %v277_v52 }
 0x305   :  { %2087 = vmatpush3.bf16.msra.mxu0 %v2372_v4  ;;  %1851 = vmatprep.mubr.msk.f32.mxu0 %vm2307_vm0, %v2308_v7 }
 0x306   :  { %2088 = vmatprep.subr.bf16.mxu0 %v2306_v3 }
 0x309   :  { %2090 = vmatpush3.bf16.msra.mxu0 %v2384_v8 }
 0x30a   :  { %2091 = vmatprep.subr.bf16.mxu0 %v2306_v3 }
 0x30d   :  { %2093 = vmatpush3.bf16.msra.mxu0 %v2398_v11 }
 0x30e   :  { %2106 = vmatprep.subr.bf16.mxu0 %v2306_v3 }
 0x364   :  { %v251_v54 = vpop.f32.mrb[2].mxu1 }
 0x365   :  { %v252_v55 = vadd.f32 %v2507_v53, %v251_v54  ;;  %v1804_v56 = vpop.f32.mrb[3].mxu1 }
 0x367   :  { %v255_v57 = vsel %vm140_vm3, %v252_v55, 0.0 }
 0x368   :  { %256 = vadd.xlane.f32.xlu1 %v255_v57 }
 0x3d7   :  { %v347_v58 = vpop.f32.mrb[0].mxu0 }
 0x3d8   :  { %v348_v59 = vadd.f32 %v2417_v15, %v347_v58  ;;  %v1819_v60 = vpop.f32.mrb[1].mxu0 }
 0x3da   :  { %v351_v61 = vsel %vm140_vm3, %v348_v59, 0.0 }
 0x3db   :  { %352 = vadd.xlane.f32.xlu0 %v351_v61 }
 0x3f5   :  { %v257_v62 = vpop.xlane.xlu1 %256 }
 0x3f6   :  { %v258_v63 = vmul.f32 0.03125, %v257_v62 }
 0x3f8   :  { %v259_v0 = vsub.f32 %v252_v55, %v258_v63 }
 0x3fa   :  { %v260_v1 = vmul.f32 %v259_v0, %v259_v0 }
 0x3fc   :  { %v261_v2 = vsel %vm140_vm3, %v260_v1, 0.0 }
 0x3fd   :  { %262 = vadd.xlane.f32.xlu0 %v261_v2 }
 0x468   :  { %v353_v5 = vpop.xlane.xlu0 %352 }
 0x469   :  { %v354_v6 = vmul.f32 0.03125, %v353_v5 }
 0x46b   :  { %v355_v9 = vsub.f32 %v348_v59, %v354_v6 }
 0x46d   :  { %v356_v10 = vmul.f32 %v355_v9, %v355_v9 }
 0x46f   :  { %v357_v12 = vsel %vm140_vm3, %v356_v10, 0.0 }
 0x470   :  { %358 = vadd.xlane.f32.xlu0 %v357_v12 }
 0x48a   :  { %v263_v13 = vpop.xlane.xlu0 %262 }
 0x48b   :  { %v264_v14 = vmul.f32 0.03125, %v263_v13 }
 0x48d   :  { %v265_v16 = vadd.f32 1e-05, %v264_v14 }
 0x48f   :  { %2221 = vrsqrt.f32 %v265_v16 }
 0x499   :  { %v2222_v17 = vpop.eup %2221 }
 0x49a   :  { %v267_v18 = vmul.f32 %v2222_v17, %v259_v0 }
 0x49c   :  { %v268_v19 = vmul.f32 %v2469_v42, %v267_v18 }
 0x49e   :  { %v269_v20 = vadd.f32 %v2474_v44, %v268_v19 }
 0x4a0   :  { %2223 = vtanh.f32 %v269_v20  ;;  %v1628_v20 = vld [vmem:[%s2752_s0 + $0x18] sm:$0xff] }
 0x4aa   :  { %v2224_v21 = vpop.eup %2223 }
 0x4ab   :  { %368 = vrot.lane.b32.xlu0 %v2224_v21, %s2309_s4 }
 0x4fd   :  { %v359_v22 = vpop.xlane.xlu0 %358 }
 0x4fe   :  { %v360_v23 = vmul.f32 0.03125, %v359_v22 }
 0x500   :  { %v361_v24 = vadd.f32 1e-05, %v360_v23 }
 0x502   :  { %2225 = vrsqrt.f32 %v361_v24 }
 0x50c   :  { %v2226_v25 = vpop.eup %2225 }
 0x50d   :  { %v363_v26 = vmul.f32 %v2226_v25, %v355_v9 }
 0x50f   :  { %v364_v27 = vmul.f32 %v2469_v42, %v363_v26 }
 0x511   :  { %v365_v29 = vadd.f32 %v2474_v44, %v364_v27 }
 0x513   :  { %2227 = vtanh.f32 %v365_v29 }
 0x51d   :  { %v2228_v30 = vpop.eup %2227  ;;  %v369_v32 = vpop.permute.xlu0 %368 }
 0x51e   :  { %v371_v33 = vsel %vm140_vm3, %v2228_v30, %v369_v32  ;;  %464 = vrot.lane.b32.xlu1 %v2228_v30, %s2305_s15 }
 0x51f   :  { %1837 = vmatmul.mubr.msk.f32.vlgmr.msra.gmra.mrb[4].mxu1 %vm181_vm4, %v371_v33 }
 0x520   :  { %2096 = vmatpush3.bf16.msra.mxu1 %v2432_v28  ;;  %1870 = vmatprep.mubr.msk.f32.mxu1 %vm2307_vm0, %v2308_v7 }
 0x521   :  { %2097 = vmatprep.subr.bf16.mxu1 %v2306_v3 }
 0x524   :  { %2099 = vmatpush3.bf16.msra.mxu1 %v2442_v31 }
 0x525   :  { %2100 = vmatprep.subr.bf16.mxu1 %v2306_v3 }
 0x528   :  { %2102 = vmatpush3.bf16.msra.mxu1 %v2451_v34 }
 0x529   :  { %2103 = vmatprep.subr.bf16.mxu1 %v2306_v3 }
 0x52c   :  { %2105 = vmatpush3.bf16.msra.mxu1 %v2461_v37 }
 0x52d   :  { %2127 = vmatprep.subr.bf16.mxu1 %v2306_v3 }
 0x590   :  { %v465_v36 = vpop.permute.xlu1 %464 }
 0x591   :  { %v467_v38 = vsel %vm58_vm1, %v1625_v35, %v465_v36 }
 0x592   :  { %1852 = vmatmul.mubr.msk.f32.vlgmr.msra.gmra.mrb[2].mxu0 %vm66_vm2, %v467_v38 }
 0x593   :  { %2108 = vmatpush3.bf16.msra.mxu0 %v2372_v4  ;;  %1885 = vmatprep.mubr.msk.f32.mxu0 %vm2307_vm0, %v2308_v7 }
 0x594   :  { %2109 = vmatprep.subr.bf16.mxu0 %v2306_v3 }
 0x597   :  { %2111 = vmatpush3.bf16.msra.mxu0 %v2384_v8 }
 0x598   :  { %2112 = vmatprep.subr.bf16.mxu0 %v2306_v3 }
 0x59b   :  { %2114 = vmatpush3.bf16.msra.mxu0 %v2398_v11 }
 0x59c   :  { %2115 = vmatprep.subr.bf16.mxu0 %v2306_v3 }
 0x5f2   :  { %v441_v39 = vpop.f32.mrb[4].mxu1 }
 0x5f3   :  { %v442_v40 = vadd.f32 %v2507_v53, %v441_v39  ;;  %v1838_v41 = vpop.f32.mrb[5].mxu1 }
 0x5f5   :  { %v445_v43 = vsel %vm140_vm3, %v442_v40, 0.0 }
 0x5f6   :  { %446 = vadd.xlane.f32.xlu0 %v445_v43 }
 0x665   :  { %v537_v45 = vpop.f32.mrb[2].mxu0 }
 0x666   :  { %v538_v46 = vadd.f32 %v2417_v15, %v537_v45  ;;  %v1853_v47 = vpop.f32.mrb[3].mxu0 }
 0x668   :  { %v541_v48 = vsel %vm140_vm3, %v538_v46, 0.0 }
 0x669   :  { %542 = vadd.xlane.f32.xlu1 %v541_v48 }
 0x683   :  { %v447_v49 = vpop.xlane.xlu0 %446 }
 0x684   :  { %v448_v50 = vmul.f32 0.03125, %v447_v49 }
 0x686   :  { %v449_v51 = vsub.f32 %v442_v40, %v448_v50 }
 0x688   :  { %v450_v52 = vmul.f32 %v449_v51, %v449_v51 }
 0x68a   :  { %v451_v54 = vsel %vm140_vm3, %v450_v52, 0.0 }
 0x68b   :  { %452 = vadd.xlane.f32.xlu0 %v451_v54 }
 0x6f6   :  { %v543_v55 = vpop.xlane.xlu1 %542 }
 0x6f7   :  { %v544_v56 = vmul.f32 0.03125, %v543_v55 }
 0x6f9   :  { %v545_v57 = vsub.f32 %v538_v46, %v544_v56 }
 0x6fb   :  { %v546_v58 = vmul.f32 %v545_v57, %v545_v57 }
 0x6fd   :  { %v547_v59 = vsel %vm140_vm3, %v546_v58, 0.0 }
 0x6fe   :  { %548 = vadd.xlane.f32.xlu0 %v547_v59 }
 0x718   :  { %v453_v60 = vpop.xlane.xlu0 %452 }
 0x719   :  { %v454_v61 = vmul.f32 0.03125, %v453_v60 }
 0x71b   :  { %v455_v62 = vadd.f32 1e-05, %v454_v61 }
 0x71d   :  { %2229 = vrsqrt.f32 %v455_v62 }
 0x727   :  { %v2230_v63 = vpop.eup %2229 }
 0x728   :  { %v457_v0 = vmul.f32 %v2230_v63, %v449_v51 }
 0x72a   :  { %v458_v1 = vmul.f32 %v2469_v42, %v457_v0 }
 0x72c   :  { %v459_v2 = vadd.f32 %v2474_v44, %v458_v1 }
 0x72e   :  { %2231 = vtanh.f32 %v459_v2  ;;  %v1631_v2 = vld [vmem:[%s2752_s0 + $0x20] sm:$0xff] }
 0x738   :  { %v2232_v5 = vpop.eup %2231 }
 0x739   :  { %558 = vrot.lane.b32.xlu0 %v2232_v5, %s2309_s4 }
 0x78b   :  { %v549_v6 = vpop.xlane.xlu0 %548 }
 0x78c   :  { %v550_v9 = vmul.f32 0.03125, %v549_v6 }
 0x78e   :  { %v551_v10 = vadd.f32 1e-05, %v550_v9 }
 0x790   :  { %2233 = vrsqrt.f32 %v551_v10 }
 0x79a   :  { %v2234_v12 = vpop.eup %2233 }
 0x79b   :  { %v553_v13 = vmul.f32 %v2234_v12, %v545_v57 }
 0x79d   :  { %v554_v14 = vmul.f32 %v2469_v42, %v553_v13 }
 0x79f   :  { %v555_v16 = vadd.f32 %v2474_v44, %v554_v14 }
 0x7a1   :  { %2235 = vtanh.f32 %v555_v16 }
 0x7ab   :  { %v2236_v17 = vpop.eup %2235  ;;  %v559_v18 = vpop.permute.xlu0 %558 }
 0x7ac   :  { %v561_v19 = vsel %vm140_vm3, %v2236_v17, %v559_v18  ;;  %654 = vrot.lane.b32.xlu1 %v2236_v17, %s2305_s15 }
 0x7ad   :  { %1871 = vmatmul.mubr.msk.f32.vlgmr.msra.gmra.mrb[6].mxu1 %vm181_vm4, %v561_v19 }
 0x7ae   :  { %2129 = vmatpush3.bf16.msra.mxu1 %v2372_v4  ;;  %1919 = vmatprep.mubr.msk.f32.mxu1 %vm2307_vm0, %v2308_v7 }
 0x7af   :  { %2130 = vmatprep.subr.bf16.mxu1 %v2306_v3 }
 0x7b2   :  { %2132 = vmatpush3.bf16.msra.mxu1 %v2384_v8 }
 0x7b3   :  { %2133 = vmatprep.subr.bf16.mxu1 %v2306_v3 }
 0x7b6   :  { %2135 = vmatpush3.bf16.msra.mxu1 %v2398_v11 }
 0x7b7   :  { %2136 = vmatprep.subr.bf16.mxu1 %v2306_v3 }
 0x81e   :  { %v655_v21 = vpop.permute.xlu1 %654 }
 0x81f   :  { %v657_v22 = vsel %vm58_vm1, %v1628_v20, %v655_v21 }
 0x820   :  { %1886 = vmatmul.mubr.msk.f32.vlgmr.msra.gmra.mrb[4].mxu0 %vm66_vm2, %v657_v22 }
 0x821   :  { %2117 = vmatpush3.bf16.msra.mxu0 %v2432_v28  ;;  %1904 = vmatprep.mubr.msk.f32.mxu0 %vm2307_vm0, %v2308_v7 }
 0x822   :  { %2118 = vmatprep.subr.bf16.mxu0 %v2306_v3 }
 0x825   :  { %2120 = vmatpush3.bf16.msra.mxu0 %v2442_v31 }
 0x826   :  { %2121 = vmatprep.subr.bf16.mxu0 %v2306_v3 }
 0x829   :  { %2123 = vmatpush3.bf16.msra.mxu0 %v2451_v34 }
 0x82a   :  { %2124 = vmatprep.subr.bf16.mxu0 %v2306_v3 }
 0x82d   :  { %2126 = vmatpush3.bf16.msra.mxu0 %v2461_v37 }
 0x82e   :  { %2148 = vmatprep.subr.bf16.mxu0 %v2306_v3 }
 0x880   :  { %v631_v23 = vpop.f32.mrb[6].mxu1 }
 0x881   :  { %v632_v24 = vadd.f32 %v2507_v53, %v631_v23  ;;  %v1872_v25 = vpop.f32.mrb[7].mxu1 }
 0x883   :  { %v635_v26 = vsel %vm140_vm3, %v632_v24, 0.0 }
 0x884   :  { %636 = vadd.xlane.f32.xlu0 %v635_v26 }
 0x8f3   :  { %v727_v27 = vpop.f32.mrb[4].mxu0 }
 0x8f4   :  { %v728_v29 = vadd.f32 %v2417_v15, %v727_v27  ;;  %v1887_v30 = vpop.f32.mrb[5].mxu0 }
 0x8f6   :  { %v731_v32 = vsel %vm140_vm3, %v728_v29, 0.0 }
 0x8f7   :  { %732 = vadd.xlane.f32.xlu1 %v731_v32 }
 0x911   :  { %v637_v33 = vpop.xlane.xlu0 %636 }
 0x912   :  { %v638_v35 = vmul.f32 0.03125, %v637_v33 }
 0x914   :  { %v639_v36 = vsub.f32 %v632_v24, %v638_v35 }
 0x916   :  { %v640_v38 = vmul.f32 %v639_v36, %v639_v36 }
 0x918   :  { %v641_v39 = vsel %vm140_vm3, %v640_v38, 0.0 }
 0x919   :  { %642 = vadd.xlane.f32.xlu0 %v641_v39 }
 0x984   :  { %v733_v40 = vpop.xlane.xlu1 %732 }
 0x985   :  { %v734_v41 = vmul.f32 0.03125, %v733_v40 }
 0x987   :  { %v735_v43 = vsub.f32 %v728_v29, %v734_v41 }
 0x989   :  { %v736_v45 = vmul.f32 %v735_v43, %v735_v43 }
 0x98b   :  { %v737_v46 = vsel %vm140_vm3, %v736_v45, 0.0 }
 0x98c   :  { %738 = vadd.xlane.f32.xlu0 %v737_v46 }
 0x9a6   :  { %v643_v47 = vpop.xlane.xlu0 %642 }
 0x9a7   :  { %v644_v48 = vmul.f32 0.03125, %v643_v47 }
 0x9a9   :  { %v645_v49 = vadd.f32 1e-05, %v644_v48 }
 0x9ab   :  { %2237 = vrsqrt.f32 %v645_v49 }
 0x9b5   :  { %v2238_v50 = vpop.eup %2237 }
 0x9b6   :  { %v647_v51 = vmul.f32 %v2238_v50, %v639_v36 }
 0x9b8   :  { %v648_v52 = vmul.f32 %v2469_v42, %v647_v51 }
 0x9ba   :  { %v649_v54 = vadd.f32 %v2474_v44, %v648_v52 }
 0x9bc   :  { %2239 = vtanh.f32 %v649_v54  ;;  %v1634_v54 = vld [vmem:[%s2752_s0 + $0x28] sm:$0xff] }
 0x9c6   :  { %v2240_v55 = vpop.eup %2239 }
 0x9c7   :  { %748 = vrot.lane.b32.xlu1 %v2240_v55, %s2309_s4 }
 0xa19   :  { %v739_v56 = vpop.xlane.xlu0 %738 }
 0xa1a   :  { %v740_v57 = vmul.f32 0.03125, %v739_v56 }
 0xa1c   :  { %v741_v58 = vadd.f32 1e-05, %v740_v57 }
 0xa1e   :  { %2241 = vrsqrt.f32 %v741_v58 }
 0xa28   :  { %v2242_v59 = vpop.eup %2241 }
 0xa29   :  { %v743_v60 = vmul.f32 %v2242_v59, %v735_v43 }
 0xa2b   :  { %v744_v61 = vmul.f32 %v2469_v42, %v743_v60 }
 0xa2d   :  { %v745_v62 = vadd.f32 %v2474_v44, %v744_v61 }
 0xa2f   :  { %2243 = vtanh.f32 %v745_v62 }
 0xa39   :  { %v2244_v63 = vpop.eup %2243  ;;  %v749_v0 = vpop.permute.xlu1 %748 }
 0xa3a   :  { %v751_v1 = vsel %vm140_vm3, %v2244_v63, %v749_v0  ;;  %844 = vrot.lane.b32.xlu0 %v2244_v63, %s2305_s15 }
 0xa3b   :  { %1905 = vmatmul.mubr.msk.f32.vlgmr.msra.gmra.mrb[6].mxu0 %vm181_vm4, %v751_v1 }
 0xa3c   :  { %2150 = vmatpush3.bf16.msra.mxu0 %v2372_v4  ;;  %1953 = vmatprep.mubr.msk.f32.mxu0 %vm2307_vm0, %v2308_v7 }
 0xa3d   :  { %2151 = vmatprep.subr.bf16.mxu0 %v2306_v3 }
 0xa40   :  { %2153 = vmatpush3.bf16.msra.mxu0 %v2384_v8 }
 0xa41   :  { %2154 = vmatprep.subr.bf16.mxu0 %v2306_v3 }
 0xa44   :  { %2156 = vmatpush3.bf16.msra.mxu0 %v2398_v11 }
 0xa45   :  { %2157 = vmatprep.subr.bf16.mxu0 %v2306_v3 }
 0xaac   :  { %v845_v5 = vpop.permute.xlu0 %844 }
 0xaad   :  { %v847_v6 = vsel %vm58_vm1, %v1631_v2, %v845_v5 }
 0xaae   :  { %1920 = vmatmul.mubr.msk.f32.vlgmr.msra.gmra.mrb[8].mxu1 %vm66_vm2, %v847_v6 }
 0xaaf   :  { %2138 = vmatpush3.bf16.msra.mxu1 %v2432_v28  ;;  %1938 = vmatprep.mubr.msk.f32.mxu1 %vm2307_vm0, %v2308_v7 }
 0xab0   :  { %2139 = vmatprep.subr.bf16.mxu1 %v2306_v3 }
 0xab3   :  { %2141 = vmatpush3.bf16.msra.mxu1 %v2442_v31 }
 0xab4   :  { %2142 = vmatprep.subr.bf16.mxu1 %v2306_v3 }
 0xab7   :  { %2144 = vmatpush3.bf16.msra.mxu1 %v2451_v34 }
 0xab8   :  { %2145 = vmatprep.subr.bf16.mxu1 %v2306_v3 }
 0xabb   :  { %2147 = vmatpush3.bf16.msra.mxu1 %v2461_v37 }
 0xabc   :  { %2169 = vmatprep.subr.bf16.mxu1 %v2306_v3 }
 0xb0e   :  { %v821_v9 = vpop.f32.mrb[6].mxu0 }
 0xb0f   :  { %v822_v10 = vadd.f32 %v2507_v53, %v821_v9  ;;  %v1906_v12 = vpop.f32.mrb[7].mxu0 }
 0xb11   :  { %v825_v13 = vsel %vm140_vm3, %v822_v10, 0.0 }
 0xb12   :  { %826 = vadd.xlane.f32.xlu1 %v825_v13 }
 0xb81   :  { %v917_v14 = vpop.f32.mrb[8].mxu1 }
 0xb82   :  { %v918_v16 = vadd.f32 %v2417_v15, %v917_v14  ;;  %v1921_v17 = vpop.f32.mrb[9].mxu1 }
 0xb84   :  { %v921_v18 = vsel %vm140_vm3, %v918_v16, 0.0 }
 0xb85   :  { %922 = vadd.xlane.f32.xlu0 %v921_v18 }
 0xb9f   :  { %v827_v19 = vpop.xlane.xlu1 %826 }
 0xba0   :  { %v828_v20 = vmul.f32 0.03125, %v827_v19 }
 0xba2   :  { %v829_v21 = vsub.f32 %v822_v10, %v828_v20 }
 0xba4   :  { %v830_v22 = vmul.f32 %v829_v21, %v829_v21 }
 0xba6   :  { %v831_v23 = vsel %vm140_vm3, %v830_v22, 0.0 }
 0xba7   :  { %832 = vadd.xlane.f32.xlu1 %v831_v23 }
 0xc12   :  { %v923_v24 = vpop.xlane.xlu0 %922 }
 0xc13   :  { %v924_v25 = vmul.f32 0.03125, %v923_v24 }
 0xc15   :  { %v925_v26 = vsub.f32 %v918_v16, %v924_v25 }
 0xc17   :  { %v926_v27 = vmul.f32 %v925_v26, %v925_v26 }
 0xc19   :  { %v927_v29 = vsel %vm140_vm3, %v926_v27, 0.0 }
 0xc1a   :  { %928 = vadd.xlane.f32.xlu0 %v927_v29 }
 0xc34   :  { %v833_v30 = vpop.xlane.xlu1 %832 }
 0xc35   :  { %v834_v32 = vmul.f32 0.03125, %v833_v30 }
 0xc37   :  { %v835_v33 = vadd.f32 1e-05, %v834_v32 }
 0xc39   :  { %2245 = vrsqrt.f32 %v835_v33 }
 0xc43   :  { %v2246_v35 = vpop.eup %2245 }
 0xc44   :  { %v837_v36 = vmul.f32 %v2246_v35, %v829_v21 }
 0xc46   :  { %v838_v38 = vmul.f32 %v2469_v42, %v837_v36 }
 0xc48   :  { %v839_v39 = vadd.f32 %v2474_v44, %v838_v38 }
 0xc4a   :  { %2247 = vtanh.f32 %v839_v39  ;;  %v1637_v39 = vld [vmem:[%s2752_s0 + $0x30] sm:$0xff] }
 0xc54   :  { %v2248_v40 = vpop.eup %2247 }
 0xc55   :  { %938 = vrot.lane.b32.xlu1 %v2248_v40, %s2309_s4 }
 0xca7   :  { %v929_v41 = vpop.xlane.xlu0 %928 }
 0xca8   :  { %v930_v43 = vmul.f32 0.03125, %v929_v41 }
 0xcaa   :  { %v931_v45 = vadd.f32 1e-05, %v930_v43 }
 0xcac   :  { %2249 = vrsqrt.f32 %v931_v45 }
 0xcb6   :  { %v2250_v46 = vpop.eup %2249 }
 0xcb7   :  { %v933_v47 = vmul.f32 %v2250_v46, %v925_v26 }
 0xcb9   :  { %v934_v48 = vmul.f32 %v2469_v42, %v933_v47 }
 0xcbb   :  { %v935_v49 = vadd.f32 %v2474_v44, %v934_v48 }
 0xcbd   :  { %2251 = vtanh.f32 %v935_v49 }
 0xcc7   :  { %v2252_v50 = vpop.eup %2251  ;;  %v939_v51 = vpop.permute.xlu1 %938 }
 0xcc8   :  { %v941_v52 = vsel %vm140_vm3, %v2252_v50, %v939_v51  ;;  %1034 = vrot.lane.b32.xlu0 %v2252_v50, %s2305_s15 }
 0xcc9   :  { %1939 = vmatmul.mubr.msk.f32.vlgmr.msra.gmra.mrb[10].mxu1 %vm181_vm4, %v941_v52 }
 0xcca   :  { %2171 = vmatpush3.bf16.msra.mxu1 %v2372_v4  ;;  %1987 = vmatprep.mubr.msk.f32.mxu1 %vm2307_vm0, %v2308_v7 }
 0xccb   :  { %2172 = vmatprep.subr.bf16.mxu1 %v2306_v3 }
 0xcce   :  { %2174 = vmatpush3.bf16.msra.mxu1 %v2384_v8 }
 0xccf   :  { %2175 = vmatprep.subr.bf16.mxu1 %v2306_v3 }
 0xcd2   :  { %2177 = vmatpush3.bf16.msra.mxu1 %v2398_v11 }
 0xcd3   :  { %2178 = vmatprep.subr.bf16.mxu1 %v2306_v3 }
 0xd3a   :  { %v1035_v55 = vpop.permute.xlu0 %1034 }
 0xd3b   :  { %v1037_v56 = vsel %vm58_vm1, %v1634_v54, %v1035_v55 }
 0xd3c   :  { %1954 = vmatmul.mubr.msk.f32.vlgmr.msra.gmra.mrb[8].mxu0 %vm66_vm2, %v1037_v56 }
 0xd3d   :  { %2159 = vmatpush3.bf16.msra.mxu0 %v2432_v28  ;;  %1972 = vmatprep.mubr.msk.f32.mxu0 %vm2307_vm0, %v2308_v7 }
 0xd3e   :  { %2160 = vmatprep.subr.bf16.mxu0 %v2306_v3 }
 0xd41   :  { %2162 = vmatpush3.bf16.msra.mxu0 %v2442_v31 }
 0xd42   :  { %2163 = vmatprep.subr.bf16.mxu0 %v2306_v3 }
 0xd45   :  { %2165 = vmatpush3.bf16.msra.mxu0 %v2451_v34 }
 0xd46   :  { %2166 = vmatprep.subr.bf16.mxu0 %v2306_v3 }
 0xd49   :  { %2168 = vmatpush3.bf16.msra.mxu0 %v2461_v37 }
 0xd4a   :  { %2190 = vmatprep.subr.bf16.mxu0 %v2306_v3 }
 0xd9c   :  { %v1011_v57 = vpop.f32.mrb[10].mxu1 }
 0xd9d   :  { %v1012_v58 = vadd.f32 %v2507_v53, %v1011_v57  ;;  %v1940_v59 = vpop.f32.mrb[11].mxu1 }
 0xd9f   :  { %v1015_v60 = vsel %vm140_vm3, %v1012_v58, 0.0 }
 0xda0   :  { %1016 = vadd.xlane.f32.xlu1 %v1015_v60 }
 0xe0f   :  { %v1107_v61 = vpop.f32.mrb[8].mxu0 }
 0xe10   :  { %v1108_v62 = vadd.f32 %v2417_v15, %v1107_v61  ;;  %v1955_v63 = vpop.f32.mrb[9].mxu0 }
 0xe12   :  { %v1111_v0 = vsel %vm140_vm3, %v1108_v62, 0.0 }
 0xe13   :  { %1112 = vadd.xlane.f32.xlu0 %v1111_v0 }
 0xe2d   :  { %v1017_v1 = vpop.xlane.xlu1 %1016 }
 0xe2e   :  { %v1018_v2 = vmul.f32 0.03125, %v1017_v1 }
 0xe30   :  { %v1019_v5 = vsub.f32 %v1012_v58, %v1018_v2 }
 0xe32   :  { %v1020_v6 = vmul.f32 %v1019_v5, %v1019_v5 }
 0xe34   :  { %v1021_v9 = vsel %vm140_vm3, %v1020_v6, 0.0 }
 0xe35   :  { %1022 = vadd.xlane.f32.xlu1 %v1021_v9 }
 0xea0   :  { %v1113_v10 = vpop.xlane.xlu0 %1112 }
 0xea1   :  { %v1114_v12 = vmul.f32 0.03125, %v1113_v10 }
 0xea3   :  { %v1115_v13 = vsub.f32 %v1108_v62, %v1114_v12 }
 0xea5   :  { %v1116_v14 = vmul.f32 %v1115_v13, %v1115_v13 }
 0xea7   :  { %v1117_v16 = vsel %vm140_vm3, %v1116_v14, 0.0 }
 0xea8   :  { %1118 = vadd.xlane.f32.xlu0 %v1117_v16 }
 0xec2   :  { %v1023_v17 = vpop.xlane.xlu1 %1022 }
 0xec3   :  { %v1024_v18 = vmul.f32 0.03125, %v1023_v17 }
 0xec5   :  { %v1025_v19 = vadd.f32 1e-05, %v1024_v18 }
 0xec7   :  { %2253 = vrsqrt.f32 %v1025_v19 }
 0xed1   :  { %v2254_v20 = vpop.eup %2253 }
 0xed2   :  { %v1027_v21 = vmul.f32 %v2254_v20, %v1019_v5  ;;  %v1640_v20 = vld [vmem:[%s2752_s0 + $0x38] sm:$0xff]  ;;  %s2310_s0 = smov [#allocation2]  }
 0xed4   :  { %v1028_v22 = vmul.f32 %v2469_v42, %v1027_v21 }
 0xed6   :  { %v1029_v23 = vadd.f32 %v2474_v44, %v1028_v22 }
 0xed8   :  { %2255 = vtanh.f32 %v1029_v23 }
 0xee2   :  { %v2256_v24 = vpop.eup %2255 }
 0xee3   :  { %1128 = vrot.lane.b32.xlu1 %v2256_v24, %s2309_s4 }
 0xf35   :  { %v1119_v25 = vpop.xlane.xlu0 %1118 }
 0xf36   :  { %v1120_v26 = vmul.f32 0.03125, %v1119_v25 }
 0xf38   :  { %v1121_v27 = vadd.f32 1e-05, %v1120_v26 }
 0xf3a   :  { %2257 = vrsqrt.f32 %v1121_v27 }
 0xf44   :  { %v2258_v29 = vpop.eup %2257 }
 0xf45   :  { %v1123_v30 = vmul.f32 %v2258_v29, %v1115_v13 }
 0xf47   :  { %v1124_v32 = vmul.f32 %v2469_v42, %v1123_v30 }
 0xf49   :  { %v1125_v33 = vadd.f32 %v2474_v44, %v1124_v32 }
 0xf4b   :  { %2259 = vtanh.f32 %v1125_v33 }
 0xf55   :  { %v2260_v35 = vpop.eup %2259  ;;  %v1129_v36 = vpop.permute.xlu1 %1128 }
 0xf56   :  { %v1131_v38 = vsel %vm140_vm3, %v2260_v35, %v1129_v36  ;;  %1224 = vrot.lane.b32.xlu0 %v2260_v35, %s2305_s15 }
 0xf57   :  { %1973 = vmatmul.mubr.msk.f32.vlgmr.msra.gmra.mrb[10].mxu0 %vm181_vm4, %v1131_v38 }
 0xf58   :  { %2192 = vmatpush3.bf16.msra.mxu0 %v2372_v4  ;;  %2021 = vmatprep.mubr.msk.f32.mxu0 %vm2307_vm0, %v2308_v7 }
 0xf59   :  { %2193 = vmatprep.subr.bf16.mxu0 %v2306_v3 }
 0xf5c   :  { %2195 = vmatpush3.bf16.msra.mxu0 %v2384_v8 }
 0xf5d   :  { %2196 = vmatprep.subr.bf16.mxu0 %v2306_v3 }
 0xf60   :  { %2198 = vmatpush3.bf16.msra.mxu0 %v2398_v11 }
 0xf61   :  { %2199 = vmatprep.subr.bf16.mxu0 %v2306_v3 }
 0xfc8   :  { %v1225_v40 = vpop.permute.xlu0 %1224 }
 0xfc9   :  { %v1227_v4 = vsel %vm58_vm1, %v1637_v39, %v1225_v40 }
 0xfca   :  { %1988 = vmatmul.mubr.msk.f32.vlgmr.msra.gmra.mrb[12].mxu1 %vm66_vm2, %v1227_v4 }
 0xfcb   :  { %2180 = vmatpush3.bf16.msra.mxu1 %v2432_v28  ;;  %2006 = vmatprep.mubr.msk.f32.mxu1 %vm2307_vm0, %v2308_v7 }
 0xfcc   :  { %2181 = vmatprep.subr.bf16.mxu1 %v2306_v3 }
 0xfcf   :  { %2183 = vmatpush3.bf16.msra.mxu1 %v2442_v31 }
 0xfd0   :  { %2184 = vmatprep.subr.bf16.mxu1 %v2306_v3 }
 0xfd3   :  { %2186 = vmatpush3.bf16.msra.mxu1 %v2451_v34 }
 0xfd4   :  { %2187 = vmatprep.subr.bf16.mxu1 %v2306_v3 }
 0xfd7   :  { %2189 = vmatpush3.bf16.msra.mxu1 %v2461_v37 }
0x102a   :  { %v1201_v8 = vpop.f32.mrb[10].mxu0 }
0x102b   :  { %v1202_v11 = vadd.f32 %v2507_v53, %v1201_v8  ;;  %v1974_v41 = vpop.f32.mrb[11].mxu0 }
0x102d   :  { %v1205_v43 = vsel %vm140_vm3, %v1202_v11, 0.0 }
0x102e   :  { %1206 = vadd.xlane.f32.xlu1 %v1205_v43 }
0x109d   :  { %v1297_v45 = vpop.f32.mrb[12].mxu1 }
0x109e   :  { %v1298_v46 = vadd.f32 %v2417_v15, %v1297_v45  ;;  %v1989_v47 = vpop.f32.mrb[13].mxu1 }
0x10a0   :  { %v1301_v48 = vsel %vm140_vm3, %v1298_v46, 0.0 }
0x10a1   :  { %1302 = vadd.xlane.f32.xlu0 %v1301_v48 }
0x10bb   :  { %v1207_v49 = vpop.xlane.xlu1 %1206 }
0x10bc   :  { %v1208_v50 = vmul.f32 0.03125, %v1207_v49 }
0x10be   :  { %v1209_v51 = vsub.f32 %v1202_v11, %v1208_v50 }
0x10c0   :  { %v1210_v52 = vmul.f32 %v1209_v51, %v1209_v51 }
0x10c2   :  { %v1211_v54 = vsel %vm140_vm3, %v1210_v52, 0.0 }
0x10c3   :  { %1212 = vadd.xlane.f32.xlu1 %v1211_v54 }
0x112e   :  { %v1303_v55 = vpop.xlane.xlu0 %1302 }
0x112f   :  { %v1304_v56 = vmul.f32 0.03125, %v1303_v55 }
0x1131   :  { %v1305_v57 = vsub.f32 %v1298_v46, %v1304_v56 }
0x1133   :  { %v1306_v58 = vmul.f32 %v1305_v57, %v1305_v57 }
0x1135   :  { %v1307_v59 = vsel %vm140_vm3, %v1306_v58, 0.0 }
0x1136   :  { %1308 = vadd.xlane.f32.xlu0 %v1307_v59 }
0x1150   :  { %v1213_v60 = vpop.xlane.xlu1 %1212 }
0x1151   :  { %v1214_v61 = vmul.f32 0.03125, %v1213_v60 }
0x1153   :  { %v1215_v62 = vadd.f32 1e-05, %v1214_v61 }
0x1155   :  { %2261 = vrsqrt.f32 %v1215_v62 }
0x115f   :  { %v2262_v63 = vpop.eup %2261 }
0x1160   :  { %v1217_v0 = vmul.f32 %v2262_v63, %v1209_v51 }
0x1162   :  { %v1218_v1 = vmul.f32 %v2469_v42, %v1217_v0 }
0x1164   :  { %v1219_v2 = vadd.f32 %v2474_v44, %v1218_v1 }
0x1166   :  { %2263 = vtanh.f32 %v1219_v2 }
0x1170   :  { %v2264_v5 = vpop.eup %2263 }
0x1171   :  { %1318 = vrot.lane.b32.xlu1 %v2264_v5, %s2309_s4 }
0x11c3   :  { %v1309_v6 = vpop.xlane.xlu0 %1308 }
0x11c4   :  { %v1310_v9 = vmul.f32 0.03125, %v1309_v6 }
0x11c6   :  { %v1311_v10 = vadd.f32 1e-05, %v1310_v9 }
0x11c8   :  { %2265 = vrsqrt.f32 %v1311_v10 }
0x11d2   :  { %v2266_v12 = vpop.eup %2265 }
0x11d3   :  { %v1313_v13 = vmul.f32 %v2266_v12, %v1305_v57 }
0x11d5   :  { %v1314_v14 = vmul.f32 %v2469_v42, %v1313_v13 }
0x11d7   :  { %v1315_v16 = vadd.f32 %v2474_v44, %v1314_v14 }
0x11d9   :  { %2267 = vtanh.f32 %v1315_v16 }
0x11e3   :  { %v2268_v17 = vpop.eup %2267  ;;  %v1319_v18 = vpop.permute.xlu1 %1318 }
0x11e4   :  { %v1321_v19 = vsel %vm140_vm3, %v2268_v17, %v1319_v18  ;;  %1414 = vrot.lane.b32.xlu0 %v2268_v17, %s2305_s15  ;;  %s1608_s15 = sshll.u32 %s2310_s0, 4  ;;  %s1609_s15 = int_to_ptr.vmem [resolvable:$true] %s1608_s15 }
0x11e5   :  { %2007 = vmatmul.mubr.msk.f32.vlgmr.msra.gmra.mrb[14].mxu1 %vm181_vm4, %v1321_v19  ;;  %p2286_p1 = scmp.lt.s32.totalorder %s1609_s15, %s1609_s15 }
0x1256   :  { %v1415_v21 = vpop.permute.xlu0 %1414 }
0x1257   :  { %v1417_v22 = vsel %vm58_vm1, %v1640_v20, %v1415_v21 }
0x1258   :  { %2022 = vmatmul.mubr.msk.f32.vlgmr.msra.gmra.mrb[12].mxu0 %vm66_vm2, %v1417_v22 }
0x1259   :  { %2201 = vmatpush3.bf16.msra.mxu0 %v2432_v28  ;;  %2040 = vmatprep.mubr.msk.f32.mxu0 %vm2307_vm0, %v2308_v7 }
0x125a   :  { %2202 = vmatprep.subr.bf16.mxu0 %v2306_v3 }
0x125d   :  { %2204 = vmatpush3.bf16.msra.mxu0 %v2442_v31 }
0x125e   :  { %2205 = vmatprep.subr.bf16.mxu0 %v2306_v3 }
0x1261   :  { %2207 = vmatpush3.bf16.msra.mxu0 %v2451_v34 }
0x1262   :  { %2208 = vmatprep.subr.bf16.mxu0 %v2306_v3 }
0x1265   :  { %2210 = vmatpush3.bf16.msra.mxu0 %v2461_v37 }
0x12b8   :  { %v1391_v23 = vpop.f32.mrb[14].mxu1 }
0x12b9   :  { %v1392_v24 = vadd.f32 %v2507_v53, %v1391_v23  ;;  %v2008_v25 = vpop.f32.mrb[15].mxu1 }
0x12bb   :  { %v1395_v28 = vsel %vm140_vm3, %v1392_v24, 0.0 }
0x12bc   :  { %1396 = vadd.xlane.f32.xlu1 %v1395_v28 }
0x132b   :  { %v1487_v7 = vpop.f32.mrb[12].mxu0 }
0x132c   :  { %v1488_v26 = vadd.f32 %v2417_v15, %v1487_v7  ;;  %v2023_v27 = vpop.f32.mrb[13].mxu0 }
0x132e   :  { %v1491_v31 = vsel %vm140_vm3, %v1488_v26, 0.0 }
0x132f   :  { %1492 = vadd.xlane.f32.xlu0 %v1491_v31 }
0x1349   :  { %v1397_v29 = vpop.xlane.xlu1 %1396 }
0x134a   :  { %v1398_v34 = vmul.f32 0.03125, %v1397_v29 }
0x134c   :  { %v1399_v30 = vsub.f32 %v1392_v24, %v1398_v34 }
0x134e   :  { %v1400_v3 = vmul.f32 %v1399_v30, %v1399_v30 }
0x1350   :  { %v1401_v37 = vsel %vm140_vm3, %v1400_v3, 0.0 }
0x1351   :  { %1402 = vadd.xlane.f32.xlu1 %v1401_v37 }
0x13bc   :  { %v1493_v32 = vpop.xlane.xlu0 %1492 }
0x13bd   :  { %v1494_v33 = vmul.f32 0.03125, %v1493_v32 }
0x13bf   :  { %v1495_v35 = vsub.f32 %v1488_v26, %v1494_v33 }
0x13c1   :  { %v1496_v36 = vmul.f32 %v1495_v35, %v1495_v35 }
0x13c3   :  { %v1497_v38 = vsel %vm140_vm3, %v1496_v36, 0.0 }
0x13c4   :  { %1498 = vadd.xlane.f32.xlu0 %v1497_v38 }
0x13de   :  { %v1403_v39 = vpop.xlane.xlu1 %1402 }
0x13df   :  { %v1404_v15 = vmul.f32 0.03125, %v1403_v39 }
0x13e1   :  { %v1405_v40 = vadd.f32 1e-05, %v1404_v15 }
0x13e3   :  { %2269 = vrsqrt.f32 %v1405_v40 }
0x13ed   :  { %v2270_v4 = vpop.eup %2269 }
0x13ee   :  { %v1407_v8 = vmul.f32 %v2270_v4, %v1399_v30 }
0x13f0   :  { %v1408_v11 = vmul.f32 %v2469_v42, %v1407_v8 }
0x13f2   :  { %v1409_v41 = vadd.f32 %v2474_v44, %v1408_v11 }
0x13f4   :  { %2271 = vtanh.f32 %v1409_v41 }
0x13fe   :  { %v2272_v43 = vpop.eup %2271 }
0x13ff   :  { %1508 = vrot.lane.b32.xlu1 %v2272_v43, %s2309_s4  ;;  %s2281_s4 = scalar_lea.vmem %s1609_s15, 128 }
0x1400   :  { %p2282_p0 = scmp.ne.s32.totalorder %s1609_s15, %s2281_s4  ;;  %p2287_p2 = scmp.lt.s32.totalorder %s2281_s4, %s2281_s4 }
0x1402   :  { %p2288_p3 = por %p2287_p2, %p2286_p1 }
0x1404   :  { %p2289_p4 = pnand %p2288_p3, %p2282_p0 }
0x1451   :  { %v1499_v45 = vpop.xlane.xlu0 %1498 }
0x1452   :  { %v1500_v46 = vmul.f32 0.03125, %v1499_v45 }
0x1454   :  { %v1501_v47 = vadd.f32 1e-05, %v1500_v46 }
0x1456   :  { %2273 = vrsqrt.f32 %v1501_v47 }
0x1460   :  { %v2274_v48 = vpop.eup %2273 }
0x1461   :  { %v1503_v49 = vmul.f32 %v2274_v48, %v1495_v35 }
0x1463   :  { %v1504_v50 = vmul.f32 %v2469_v42, %v1503_v49 }
0x1465   :  { %v1505_v51 = vadd.f32 %v2474_v44, %v1504_v50 }
0x1467   :  { %2275 = vtanh.f32 %v1505_v51 }
0x1471   :  { %v2276_v52 = vpop.eup %2275  ;;  %v1509_v54 = vpop.permute.xlu1 %1508 }
0x1472   :  { %v1511_v55 = vsel %vm140_vm3, %v2276_v52, %v1509_v54 }
0x1473   :  { %2041 = vmatmul.mubr.msk.f32.vlgmr.msra.gmra.mrb[14].mxu0 %vm181_vm4, %v1511_v55 }
0x1546   :  { %v1581_v56 = vpop.f32.mrb[14].mxu0 }
0x1547   :  { %v1582_v57 = vadd.f32 %v2507_v53, %v1581_v56  ;;  %v2042_v58 = vpop.f32.mrb[15].mxu0 }
0x1549   :  { %v1585_v59 = vsel %vm140_vm3, %v1582_v57, 0.0 }
0x154a   :  { %1586 = vadd.xlane.f32.xlu0 %v1585_v59 }
0x15d7   :  { %v1587_v60 = vpop.xlane.xlu0 %1586 }
0x15d8   :  { %v1588_v61 = vmul.f32 0.03125, %v1587_v60 }
0x15da   :  { %v1589_v62 = vsub.f32 %v1582_v57, %v1588_v61 }
0x15dc   :  { %v1590_v63 = vmul.f32 %v1589_v62, %v1589_v62 }
0x15de   :  { %v1591_v0 = vsel %vm140_vm3, %v1590_v63, 0.0 }
0x15df   :  { %1592 = vadd.xlane.f32.xlu0 %v1591_v0 }
0x166c   :  { %v1593_v1 = vpop.xlane.xlu0 %1592 }
0x166d   :  { %v1594_v2 = vmul.f32 0.03125, %v1593_v1 }
0x166f   :  { %v1595_v5 = vadd.f32 1e-05, %v1594_v2 }
0x1671   :  { %2277 = vrsqrt.f32 %v1595_v5 }
0x167b   :  { %v2278_v6 = vpop.eup %2277 }
0x167c   :  { %v1597_v9 = vmul.f32 %v2278_v6, %v1589_v62 }
0x167e   :  { %v1598_v10 = vmul.f32 %v2469_v42, %v1597_v9 }
0x1680   :  { %v1599_v53 = vadd.f32 %v2474_v44, %v1598_v10 }
0x1682   :  { %2279 = vtanh.f32 %v1599_v53 }
0x168c   :  { %v2280_v12 = vpop.eup %2279 }
0x168d   :  { %1601 = vst.msk [vmem:[#allocation2] sm:$0xff] %vm140_vm3, %v2280_v12 }
0x168e   :  { %2292 = shalt.err (!%p2289_p4)
}
0x168f   :  { %s2293_s1 = scalar_lea.hbm %s2761_s9, 128 }
0x1690   :  { %p2294_p5 = scmp.ne.s32.totalorder %s2761_s9, %s2293_s1  ;;  %p2297_p6 = scmp.lt.u32.totalorder %s2293_s1, %s2761_s9 }
0x1692   :  { %p2299_p7 = pnand %p2297_p6, %p2294_p5 }
0x1694   :  { %2302 = shalt.err (!%p2299_p7)
}
0x1695   :  { %1611 = dma.vmem_to_hbm [thread:$0]  %s1609_s15, 128, %s2761_s9, [#allocation3]  }
0x1696   :  { %2303 = dma.done.wait [#allocation3], 128  }
0x1697   :  { %2304 = vsyncadd [#allocation3], 4294967168 }
0x1698   :  { %1615 = vsyncpa [#allocation3], 1 }

</bundles_post_ra>
